<compile_context>
chip_gen: v5e
topology: v5e:2x2
jax: 0.10.0
libtpu: 0.0.40
codegen_flags: <defaults>
</compile_context>

<pallas_src>
import itertools
import numpy as np
import jax
import jax.numpy as jnp
from jax.experimental import pallas as pl
from jax.experimental.pallas import tpu as pltpu


# ----------------------------------------------------------------------------
# Init-time matrix construction (plain numpy; mirrors SliceProjection.__init__)
# ----------------------------------------------------------------------------
def slice_gaussian(x, fwhm=2.0):
    return np.exp(-(np.asarray(x, dtype=np.float64) ** 2) / (0.36 * fwhm ** 2))


def compute_w(slice_profile, m):
    r = np.arange(-m, m)
    pr = slice_profile(r)
    cs = np.cumsum(pr) / pr.sum()
    left = r[int(np.argmax(cs > 0.01))]
    right = r[int(np.argmax(cs > 0.99))]
    return int(max(abs(left), abs(right)) + 1)


def quat_to_rotmat(q):
    # scipy convention: q = (x, y, z, w)
    x, y, z, w = [float(v) for v in q]
    n = x * x + y * y + z * z + w * w
    s = 2.0 / n
    return np.array(
        [
            [1 - s * (y * y + z * z), s * (x * y - z * w), s * (x * z + y * w)],
            [s * (x * y + z * w), 1 - s * (x * x + z * z), s * (y * z - x * w)],
            [s * (x * z - y * w), s * (y * z + x * w), 1 - s * (x * x + y * y)],
        ],
        dtype=np.float64,
    )


def projection_matrix_dense(input_shape, output_shape, rotation_quaternion,
                            offset, w, slice_function, rotation_center=None):
    rotmat = quat_to_rotmat(rotation_quaternion)

    def rotate(v, inverse=False):
        R = rotmat.T if inverse else rotmat
        return (v.reshape(-1, 3) @ R.T).reshape(v.shape)

    X, Y, Z = input_shape
    x, y = output_shape
    sx, sy = (X - x) // 2, (Y - y) // 2
    gx, gy = np.meshgrid(np.arange(sx, sx + x), np.arange(sy, sy + y), indexing="ij")
    pixel = np.stack([gx, gy, Z / 2 * np.ones((x, y))], axis=-1).astype(np.float64)
    pixel = pixel + np.asarray(offset, dtype=np.float64)
    if rotation_center is None:
        rotation_center = np.array([X / 2 - 0.5, Y / 2 - 0.5, Z / 2 - 0.5])
    pixel_rotated = rotate(pixel - rotation_center) + rotation_center

    ray = rotate(np.stack([np.zeros(2 * w + 1), np.zeros(2 * w + 1),
                           np.arange(-w, w + 1)], axis=-1).astype(np.float64))
    offsets = np.array(list(itertools.product([0, 1], repeat=3)), dtype=np.float64)

    points = np.floor(pixel_rotated[:, :, None, None, :]
                      + ray[None, None, None, :, :]
                      + offsets[None, None, :, None, :])           # (x, y, 8, 2w+1, 3)
    distance = pixel_rotated[:, :, None, None, :] - points
    dist_rot = rotate(distance, inverse=True)
    dx, dy, dz = dist_rot[..., 0], dist_rot[..., 1], dist_rot[..., 2]

    weight_xy = np.clip(1 - np.abs(dx), 0, None) * np.clip(1 - np.abs(dy), 0, None)
    weight_z = slice_function(dz)
    weight = (weight_xy * weight_z).reshape(x * y, -1)

    source = points.reshape(x * y, -1, 3).astype(np.int64)
    mask = ((source[..., 0] < X) & (source[..., 0] >= 0)
            & (source[..., 1] < Y) & (source[..., 1] >= 0)
            & (source[..., 2] < Z) & (source[..., 2] >= 0))
    # NOTE(parity): guard the 0/0 case (fully out-of-support pixels); the torch
    # module would produce NaN there.  Intentional divergence.
    denom = np.maximum((weight > 0).sum(-1), 1)
    fraction_in_view = (mask & (weight > 0)).sum(-1) / denom

    tgt = np.repeat(np.arange(x * y), mask.sum(-1))
    src = np.ravel_multi_index(tuple(source[mask].T), (X, Y, Z))
    vals = weight[mask]

    # Duplicate (tgt, src) entries are AVERAGED -- identical to the torch code,
    # which coalesces (summing) both the weights and a ones-matrix and divides.
    dense = np.zeros((x * y, X * Y * Z), dtype=np.float64)
    counts = np.zeros((x * y, X * Y * Z), dtype=np.float64)
    np.add.at(dense, (tgt, src), vals)
    np.add.at(counts, (tgt, src), 1.0)
    dense = np.where(counts > 0, dense / np.maximum(counts, 1.0), 0.0)

    norm = fraction_in_view / (dense.sum(1) + 1e-6)
    dense = dense * norm[:, None]
    return dense.astype(np.float32)


def build_slice_projection_matrix(input_shape, fwhm=2.0):
    """slice_rotation=None, slice_shift=0.0, slice_profile=SliceGaussian(fwhm)."""
    m = max(input_shape)
    w = compute_w(lambda r: slice_gaussian(r, fwhm), m)
    quat = (0.0, 0.0, 0.0, 1.0)
    offset = np.array([0.0, 0.0, 0.0])
    matrix = projection_matrix_dense(
        input_shape, (m, m), quat, offset, w,
        lambda r: slice_gaussian(r, fwhm))
    batch_shapes = (1,)                      # broadcast of (1,4)[:-1] and (1,) shift
    range_shape = (*batch_shapes, m, m)
    return matrix, range_shape               # (m*m, X*Y*Z), (1, m, m)


# ----------------------------------------------------------------------------
# Pallas block-banded mat-vec:  out(B, Rp) = x(B, Cp) @ banded M^T
# ----------------------------------------------------------------------------
_LANE = 128


def _round_up(a, b):
    return ((a + b - 1) // b) * b


def _chip_defaults():
    """Generation-gated tile/VMEM budgets (v5e/v6e: big VMEM & single TC;
    v7x / unknown: 64 MiB VMEM, 2 TCs -> keep >=2 'parallel' row tiles)."""
    vmem_bytes = None
    try:
        info = pltpu.get_tpu_info()
        for name in ("vmem_capacity_bytes", "vmem_bytes", "vmem_size_bytes"):
            v = getattr(info, name, None)
            if v:
                vmem_bytes = int(v)
                break
    except Exception:
        pass
    if vmem_bytes is None:
        vmem_bytes = 64 * 1024 * 1024          # assume the most restrictive (v7x)
    if vmem_bytes >= 100 * 1024 * 1024:        # v5e / v6e: 128 MiB VMEM
        return {"block_budget": 24 * 1024 * 1024,
                "vmem_limit": min(96 * 1024 * 1024, (vmem_bytes * 3) // 4),
                "row_tile": 256}
    # v7x (64 MiB per TC) or unknown
    return {"block_budget": 6 * 1024 * 1024,
            "vmem_limit": 32 * 1024 * 1024,
            "row_tile": 128}


def _make_kernels(mdtype):
    """Kernel bodies; x arrives in f32 and is cast to the weight dtype in-register."""

    def single_kernel(band_ref, x_ref, mt_ref, o_ref):
        # Whole band resident in one block: one MXU dot per row tile, no scratch.
        o_ref[...] = jnp.dot(x_ref[...].astype(mdtype), mt_ref[...],
                             preferred_element_type=jnp.float32)

    def multi_kernel(band_ref, x_ref, mt_ref, o_ref):
        # Band split across grid axis 1: accumulate directly into the f32 output.
        @pl.when(pl.program_id(1) == 0)
        def _():
            o_ref[...] = jnp.zeros_like(o_ref)

        o_ref[...] += jnp.dot(x_ref[...].astype(mdtype), mt_ref[...],
                              preferred_element_type=jnp.float32)

    return single_kernel, multi_kernel


class SliceProjectionPallas:
    """Forward-only SliceProjection (slice_rotation=None, shift=0, Gaussian profile)."""

    def __init__(self, input_shape, fwhm=2.0, matrix_dtype=jnp.float32,
                 block_budget_bytes=None, vmem_limit_bytes=None, row_tile=None):
        matrix_np, range_shape = build_slice_projection_matrix(input_shape, fwhm)
        self.matrix_np = matrix_np                     # (R, C) f32, reference
        self.range_shape = tuple(int(s) for s in range_shape)
        self.domain_shape = tuple(int(s) for s in input_shape)
        self.R, self.C = matrix_np.shape
        self.matrix_dtype = jnp.dtype(matrix_dtype)
        self.itemsize = self.matrix_dtype.itemsize

        cfg = _chip_defaults()
        self.block_budget = int(block_budget_bytes or cfg["block_budget"])
        self.vmem_limit = int(vmem_limit_bytes or cfg["vmem_limit"])
        self.tr = int(row_tile or cfg["row_tile"])

        # Column tile: largest 128-multiple so one (tc, tr) M^T block fits the budget.
        max_tc = max(_LANE, (self.block_budget // (self.tr * self.itemsize))
                     // _LANE * _LANE)
        self.tc = int(min(_round_up(self.C, _LANE), max_tc))
        self.Rp = _round_up(self.R, self.tr)
        self.Cp = _round_up(self.C, self.tc)
        self.n_r = self.Rp // self.tr
        self.n_cb = self.Cp // self.tc

        # ---- Block-banded M^T: per row tile keep only the column band that
        # carries nonzeros.  Band start blocks go to SMEM via scalar prefetch.
        band_start = np.zeros((self.n_r,), np.int32)
        widths = []
        for j in range(self.n_r):
            r0, r1 = j * self.tr, min((j + 1) * self.tr, self.R)
            nz_cols = np.nonzero(np.any(matrix_np[r0:r1] != 0.0, axis=0))[0]
            if nz_cols.size == 0:
                first_b, last_b = 0, 0
            else:
                first_b = int(nz_cols[0]) // self.tc
                last_b = int(nz_cols[-1]) // self.tc
            band_start[j] = first_b
            widths.append(last_b - first_b + 1)
        self.n_band = int(max(widths))
        band_start = np.minimum(band_start, self.n_cb - self.n_band).astype(np.int32)
        band_cols = self.n_band * self.tc

        # Pre-transposed, zero-padded, block-contiguous banded M^T (one-time host work).
        mt_full_T = np.zeros((self.Cp, self.Rp), np.float32)
        mt_full_T[:self.C, :self.R] = matrix_np.T
        mt_band = np.zeros((self.n_r, band_cols, self.tr), np.float32)
        for j in range(self.n_r):
            c0 = int(band_start[j]) * self.tc
            mt_band[j] = mt_full_T[c0:c0 + band_cols, j * self.tr:(j + 1) * self.tr]

        self.mt_band = jnp.asarray(mt_band, dtype=self.matrix_dtype)
        self.band_start = jnp.asarray(band_start)      # (n_r,) int32, SMEM prefetch

        self._single_kernel, self._multi_kernel = _make_kernels(self.matrix_dtype)
        self._matvec_cache = {}
        self._fwd = jax.jit(self._forward_impl)

    # ------------------------------------------------------------------
    def _build_matvec(self, B):
        n_r, n_band, tc, tr = self.n_r, self.n_band, self.tc, self.tr
        flops = int(2 * B * n_r * n_band * tc * tr)
        bytes_accessed = int(n_r * n_band * tc * tr * self.itemsize   # banded M^T
                             + n_r * n_band * B * tc * 4              # x re-fetches
                             + B * self.Rp * 4)                       # output
        cost = pl.CostEstimate(flops=flops, transcendentals=0,
                               bytes_accessed=bytes_accessed)

        if n_band == 1:
            grid_spec = pltpu.PrefetchScalarGridSpec(
                num_scalar_prefetch=1,
                grid=(n_r,),
                in_specs=[
                    # x band block, column block index from SMEM prefetch table
                    pl.BlockSpec((B, tc), lambda j, band: (0, band[j])),
                    # banded M^T slab for this row tile (block-contiguous in HBM)
                    pl.BlockSpec((None, tc, tr), lambda j, band: (j, 0, 0)),
                ],
                out_specs=pl.BlockSpec((B, tr), lambda j, band: (0, j)),
            )
            kernel = self._single_kernel
            dims = ("parallel",)
        else:
            grid_spec = pltpu.PrefetchScalarGridSpec(
                num_scalar_prefetch=1,
                grid=(n_r, n_band),
                in_specs=[
                    pl.BlockSpec((B, tc), lambda j, k, band: (0, band[j] + k)),
                    pl.BlockSpec((None, tc, tr), lambda j, k, band: (j, k, 0)),
                ],
                out_specs=pl.BlockSpec((B, tr), lambda j, k, band: (0, j)),
            )
            kernel = self._multi_kernel
            dims = ("parallel", "arbitrary")

        return pl.pallas_call(
            kernel,
            out_shape=jax.ShapeDtypeStruct((B, self.Rp), jnp.float32),
            grid_spec=grid_spec,
            compiler_params=pltpu.CompilerParams(
                dimension_semantics=dims,
                vmem_limit_bytes=self.vmem_limit,
            ),
            cost_estimate=cost,
        )

    def _get_matvec(self, B):
        if B not in self._matvec_cache:
            self._matvec_cache[B] = self._build_matvec(B)
        return self._matvec_cache[B]

    # ------------------------------------------------------------------
    def _forward_impl(self, x, mt_band, band_start):
        lead = x.shape[:-3] if x.ndim > 3 else ()
        B = int(np.prod(lead)) if lead else 1
        x2 = jnp.reshape(x, (B, self.C)).astype(jnp.float32)
        if self.Cp != self.C:                       # only for non-lane-multiple C
            x2 = jnp.pad(x2, ((0, 0), (0, self.Cp - self.C)))
        out = self._get_matvec(B)(band_start, x2, mt_band)     # (B, Rp) f32
        out = out[:, :self.R]
        return out.reshape(lead + self.range_shape)

    def __call__(self, x):
        return self._fwd(x, self.mt_band, self.band_start)


# ----------------------------------------------------------------------------
if __name__ == "__main__":
    input_shape = (16, 16, 16)                         # (X, Y, Z) volume

    key = jax.random.PRNGKey(0)
    x_vol = jax.random.normal(key, input_shape, dtype=jnp.float32)

    # --- f32 weights: exact match to the torch f32 sparse matmul semantics ---
    proj = SliceProjectionPallas(input_shape, fwhm=2.0, matrix_dtype=jnp.float32)
    out = jax.block_until_ready(proj(x_vol))
    ref = (jnp.asarray(proj.matrix_np) @ x_vol.reshape(-1)).reshape(proj.range_shape)
    np.testing.assert_allclose(np.asarray(out), np.asarray(ref),
                               rtol=1e-5, atol=1e-5)
    assert out.shape == proj.range_shape == (1, 16, 16)

    # --- batched path: M^T band streamed once for all B volumes ---
    xb = jax.random.normal(jax.random.PRNGKey(1), (4,) + input_shape,
                           dtype=jnp.float32)
    out_b = jax.block_until_ready(proj(xb))
    ref_b = jnp.einsum("rc,bc->br", jnp.asarray(proj.matrix_np),
                       xb.reshape(4, -1)).reshape(4, *proj.range_shape)
    np.testing.assert_allclose(np.asarray(out_b), np.asarray(ref_b),
                               rtol=1e-5, atol=1e-5)

    # --- multi-band path (band split over grid axis 1, accumulate into o_ref),
    #     forced via a tiny block budget so it is actually exercised ---
    proj_small = SliceProjectionPallas(input_shape, fwhm=2.0,
                                       matrix_dtype=jnp.float32,
                                       block_budget_bytes=128 * 1024,
                                       row_tile=128)
    assert proj_small.n_band > 1, "multi-band path not exercised"
    out_s = jax.block_until_ready(proj_small(x_vol))
    np.testing.assert_allclose(np.asarray(out_s), np.asarray(ref),
                               rtol=1e-5, atol=1e-5)

    # --- bf16 weights (halves HBM traffic on this BW-bound matvec), f32 accum ---
    proj_bf16 = SliceProjectionPallas(input_shape, fwhm=2.0,
                                      matrix_dtype=jnp.bfloat16)
    out_bf = jax.block_until_ready(proj_bf16(x_vol))
    m_bf = jnp.asarray(proj.matrix_np).astype(jnp.bfloat16).astype(jnp.float32)
    x_bf = x_vol.reshape(-1).astype(jnp.bfloat16).astype(jnp.float32)
    ref_bf = (m_bf @ x_bf).reshape(proj.range_shape)
    np.testing.assert_allclose(np.asarray(out_bf), np.asarray(ref_bf),
                               rtol=5e-3, atol=5e-3)

    print("KERNEL_OK")
</pallas_src>

<mosaic_0001>
module attributes {stable_mosaic.version = 11 : i64} {
  func.func @single_kernel(%arg0: i32, %arg1: memref<2xi32, #tpu.memory_space<smem>>, %arg2: memref<1x4096xf32, #tpu.memory_space<vmem>>, %arg3: memref<1x4096x128xf32, #tpu.memory_space<vmem>>, %arg4: memref<1x128xf32, #tpu.memory_space<vmem>>) attributes {dimension_semantics = [#tpu.dimension_semantics<parallel>], iteration_bounds = array<i64: 2>, scalar_prefetch = 1 : i64, scratch_operands = 0 : i64, tpu.core_type = #tpu.core_type<tc>, window_params = [{transform_indices = @transform_0, window_bounds = array<i64: 1, 4096>}, {transform_indices = @transform_1, window_bounds = array<i64: 1, 4096, 128>}, {transform_indices = @transform_2, window_bounds = array<i64: 1, 128>}]} {
    %c0 = arith.constant 0 : index
    %c0_0 = arith.constant 0 : index
    %0 = vector.load %arg2[%c0, %c0_0] : memref<1x4096xf32, #tpu.memory_space<vmem>>, vector<1x4096xf32>
    %c0_1 = arith.constant 0 : index
    %c0_2 = arith.constant 0 : index
    %c0_3 = arith.constant 0 : index
    %1 = vector.load %arg3[%c0_1, %c0_2, %c0_3] : memref<1x4096x128xf32, #tpu.memory_space<vmem>>, vector<1x4096x128xf32>
    %2 = vector.shape_cast %1 : vector<1x4096x128xf32> to vector<4096x128xf32>
    %cst = arith.constant dense<0.000000e+00> : vector<1x128xf32>
    %3 = tpu.matmul %0, %2, %cst {dimension_numbers = #tpu.dot_dimension_numbers<[1], [0], [0], [1], [0, 0, 1, 1], [], []>} : vector<1x4096xf32>, vector<4096x128xf32>, vector<1x128xf32> -> vector<1x128xf32>
    %c0_4 = arith.constant 0 : index
    %c0_5 = arith.constant 0 : index
    %4 = vector.load %arg4[%c0_4, %c0_5] : memref<1x128xf32, #tpu.memory_space<vmem>>, vector<1x128xf32>
    tpu.vector_store %arg4[%c0_4, %c0_5], %3 {strides = array<i32>} : memref<1x128xf32, #tpu.memory_space<vmem>>, vector<1x128xf32>,
    return
  }
  func.func @transform_0(%arg0: i32, %arg1: memref<2xi32, #tpu.memory_space<smem>>) -> (i32, i32) {
    %0 = arith.index_cast %arg0 : i32 to index
    %1 = memref.load %arg1[%0] : memref<2xi32, #tpu.memory_space<smem>>
    %c0_i32 = arith.constant 0 : i32
    %c0_i32_0 = arith.constant 0 : i32
    return %c0_i32, %1 : i32, i32
  }
  func.func @transform_1(%arg0: i32, %arg1: memref<2xi32, #tpu.memory_space<smem>>) -> (i32, i32, i32) {
    %c0_i32 = arith.constant 0 : i32
    %c0_i32_0 = arith.constant 0 : i32
    %c0_i32_1 = arith.constant 0 : i32
    return %arg0, %c0_i32, %c0_i32_0 : i32, i32, i32
  }
  func.func @transform_2(%arg0: i32, %arg1: memref<2xi32, #tpu.memory_space<smem>>) -> (i32, i32) {
    %c0_i32 = arith.constant 0 : i32
    %c0_i32_0 = arith.constant 0 : i32
    return %c0_i32, %arg0 : i32, i32
  }
}

</mosaic_0001>

<bundles_post_ra>
// kernel: _forward_impl.1
= control target key start
LH: loop header
LB: loop body
LE: loop exit
PB: predicated region body
PF: predicated region fallthrough
CT: control target
= control target key end

     0   :  { %s1624_s15 = smov [#allocation3]   ;;  %s2319_s0 = inlined_call_operand.hbm [shape: s32[2], index: 0, kind: input, shape index: {}]   ;;  %s2320_s1 = inlined_call_operand.vmem [shape: f32[1,4096], index: 1, kind: input, shape index: {}]   ;;  %s2321_s2 = inlined_call_operand.hbm [shape: f32[2,4096,128], index: 2, kind: input, shape index: {}]   ;;  %s2322_s3 = inlined_call_operand.vmem [shape: f32[1,256], index: 3, kind: output, shape index: {}]  }
   0x1   :  { %s9_s14 = sshll.u32 %s2319_s0, 4  ;;  %s10_s14 = int_to_ptr.hbm [resolvable:$true] %s9_s14 }
   0x2   :  { %12 = dma.hbm_to_smem %s10_s14, 16, %s1624_s15, [#allocation2] }
   0x3   :  { %1602 = dma.done.wait [#allocation2], 16 }
   0x4   :  { %1603 = vsyncadd [#allocation2], 4294967280 }
   0x5   :  { %15 = sfence }
   0x6   :  { %16 = vsyncpa [#allocation5], 0 }
   0x7   :  { %18 = vsyncpa [#allocation5 + $0x1], 0  ;;  %s1650_s16 = smov 0   ;;  %s1652_s17 = smov 0  }
   0x8   :  { %s1654_s18 = smov 0   ;;  %s1656_s19 = smov 0  }
   0x9 LB: > { %s1669_s0 = sadd.s32 4294967295, %s1622_s19   ;;  %s1672_s20 = sadd.s32 1, %s1622_s19   ;;  %s1622_s19 = sphi %s1656_s19, %s2330_s19   ;;  %s1618_s18 = sphi %s1654_s18, %s2329_s18   ;;  %s1614_s17 = sphi %s1652_s17, %s2328_s17   ;;  %s1610_s16 = sphi %s1650_s16, %s2327_s16  }
   0xa   : > { %s56_s21 = ssub.s32 %s1622_s19, %s1672_s20  ;;  %s59_s22 = sadd.s32 1, %s1618_s18 }
   0xb   : > { %p57_p0 = scmp.eq.s32.totalorder %s56_s21, 0  ;;  %p66_p1 = scmp.ne.s32.totalorder %s1618_s18, %s1614_s17 }
   0xc   : > { %p67_p2 = scmp.eq.s32.totalorder %s1622_s19, 0  ;;  %p72_p3 = scmp.ne.s32.totalorder %s1614_s17, %s1610_s16 }
   0xd   : > { %s1682_s23 = scalar_select %p57_p0, %s1618_s18, %s59_s22  }
   0xe   : > { %p1684_p4 = por %p67_p2, %p66_p1  ;;  %p73_p5 = scmp.eq.s32.totalorder %s1669_s0, 0 }
   0xf   : > { %p1508_p6 = scmp.lt.s32.totalorder %s1622_s19, 2  ;;  %s132_s26 = sand.u32 1, %s1618_s18  }
  0x10   : > { %p1690_p7 = por %p73_p5, %p72_p3  ;;  %s1493_s27 = sshll.u32 %s132_s26, 12 }
  0x11   : > { %s1501_s28 = sshll.u32 %s1622_s19, 12  ;;  %s136_s5 = scalar_lea.vmem [#allocation4], %s1493_s27 }
  0x12   : > { %s141_s4 = scalar_lea.hbm %s2321_s2, %s1501_s28  ;;  %s144_s6 = sshll.u32 %s136_s5, 4  ;;  %s145_s6 = int_to_ptr.vmem [resolvable:$true] %s144_s6 }
  0x13   : > { %s142_s7 = sshll.u32 %s141_s4, 4  ;;  %p1701_p8 = pnand %p1508_p6, %p1684_p4  ;;  %s143_s7 = int_to_ptr.hbm [resolvable:$true] %s142_s7 }
  0x14   : > { %p1496_p9 = scmp.ge.s32.totalorder %s1622_s19, 1  ;;  %s133_s9 = scalar_lea.sflag [#allocation5], %s132_s26 }
  0x15   : > { %s1556_s10 = sshra.s32 %s143_s7, 4  ;;  %p1560_p11 = pneg %p1701_p8  ;;  %s1557_s10 = int_to_ptr.hbm [resolvable:$true] %s1556_s10 }
  0x16   : > { %s1558_s11 = scalar_lea.hbm %s1557_s10, 4096  ;;  %s1563_s14 = scalar_lea.hbm %s2321_s2, 8192 }
  0x17   : > { %p1559_p10 = scmp.ne.s32.totalorder %s1557_s10, %s1558_s11  ;;  %p1564_p0 = scmp.lt.s32.totalorder %s1557_s10, %s2321_s2 }
  0x18   : > { %p1565_p1 = scmp.lt.s32.totalorder %s1563_s14, %s1558_s11 }
  0x19   : > { %p1561_p12 = pnand %p1560_p11, %p1559_p10 }
  0x1a   : > { %p1566_p2 = por %p1565_p1, %p1564_p0 }
  0x1b   : > { %p1562_p13 = pneg %p1561_p12 }
  0x1d   : > { %p1567_p3 = pnand %p1566_p2, %p1562_p13 }
  0x1f   : > { %1570 = shalt.err (!%p1567_p3)
}
  0x20   : > { %s1625_s21 = smov 128   ;;  %s1626_s22 = smov 8  }
  0x21   : > { %1507 = dma.hbm_to_vmem [thread:$0]  (!%p1701_p8), %s143_s7, 65536, %s145_s6, %s133_s9, %s1625_s21, %s1625_s21, %s1626_s22  }
  0x22   : > { %p152_p4 = scmp.lt.s32.totalorder %s1622_s19, 3 }
  0x24   : > { %p153_p5 = pnand %p1496_p9, %p152_p4 }
  0x25   : > { %s158_s24 = sand.u32 (!%p153_p5), 1, %s1614_s17  }
  0x26   : > { %156 = sbr.rel (%p153_p5) target bundleno = 452 (0x1c4), region = 28  ;;  %s1497_s26 = sshll.u32 (!%p153_p5), %s158_s24, 12 }
  0x27   : > { %s159_s27 = scalar_lea.sflag (!%p153_p5), [#allocation5], %s158_s24  ;;  %s1720_s28 = scalar_lea.vmem (!%p153_p5), [#allocation4], %s1497_s26 }
  0x2b   : > { %1605 = dma.done.wait (%p1690_p7), %s159_s27, 65536  }
  0x2c   : > { %1607 = vsyncadd (%p1690_p7), %s159_s27, 4294901760  ;;  %v216_v0 = vld [vmem:[%s1720_s28 + $0x78] sm:$0xff]  ;;  %v215_v2 = vld [vmem:[%s1720_s28 + $0x70] sm:$0xff]  ;;  %s1799_s19 = sld [smem:[#allocation3 + %s1669_s0]]  ;;  %p194_p7 = scmp.lt.s32.totalorder %s1669_s0, 1 }
  0x2d   : > { %v248_v1 = vld [vmem:[%s1720_s28 + $0x178] sm:$0xff]  ;;  %781 = vmatpush.msra.mxu0 %v216_v0  ;;  %v247_v4 = vld [vmem:[%s1720_s28 + $0x170] sm:$0xff]  ;;  %v214_v6 = vld [vmem:[%s1720_s28 + $0x68] sm:$0xff] }
  0x2e   : > { %821 = vmatpush.msra.mxu2 %v248_v1  ;;  %v232_v3 = vld [vmem:[%s1720_s28 + $0xf8] sm:$0xff]  ;;  %v231_v7 = vld [vmem:[%s1720_s28 + $0xf0] sm:$0xff]  ;;  %v246_v8 = vld [vmem:[%s1720_s28 + $0x168] sm:$0xff]  ;;  %s2334_s0 = smov (!%p194_p7, %s1669_s0), 1 }
  0x2f   : > { %v264_v5 = vld [vmem:[%s1720_s28 + $0x1f8] sm:$0xff]  ;;  %801 = vmatpush.msra.mxu1 %v232_v3  ;;  %782 = vmatpush.msra.mxu0 %v215_v2  ;;  %v263_v9 = vld [vmem:[%s1720_s28 + $0x1f0] sm:$0xff]  ;;  %v230_v10 = vld [vmem:[%s1720_s28 + $0xe8] sm:$0xff]  ;;  %s196_s8 = scalar_lea.vmem %s2322_s3, %s2334_s0 }
  0x30   : > { %841 = vmatpush.msra.mxu3 %v264_v5  ;;  %822 = vmatpush.msra.mxu2 %v247_v4  ;;  %v213_v11 = vld [vmem:[%s1720_s28 + $0x60] sm:$0xff]  ;;  %v262_v13 = vld [vmem:[%s1720_s28 + $0x1e8] sm:$0xff]  ;;  %v212_v16 = vld [vmem:[%s1720_s28 + $0x58] sm:$0xff] }
  0x31   : > { %802 = vmatpush.msra.mxu1 %v231_v7  ;;  %v245_v12 = vld [vmem:[%s1720_s28 + $0x160] sm:$0xff]  ;;  %783 = vmatpush.msra.mxu0 %v214_v6  ;;  %v244_v17 = vld [vmem:[%s1720_s28 + $0x158] sm:$0xff]  ;;  %v211_v20 = vld [vmem:[%s1720_s28 + $0x50] sm:$0xff] }
  0x32   : > { %842 = vmatpush.msra.mxu3 %v263_v9  ;;  %823 = vmatpush.msra.mxu2 %v246_v8  ;;  %v229_v14 = vld [vmem:[%s1720_s28 + $0xe0] sm:$0xff]  ;;  %v228_v18 = vld [vmem:[%s1720_s28 + $0xd8] sm:$0xff]  ;;  %v243_v21 = vld [vmem:[%s1720_s28 + $0x150] sm:$0xff]  ;;  %s1498_s25 = sshll.u32 %s1799_s19, 5 }
  0x33   : > { %v261_v15 = vld [vmem:[%s1720_s28 + $0x1e0] sm:$0xff]  ;;  %803 = vmatpush.msra.mxu1 %v230_v10  ;;  %784 = vmatpush.msra.mxu0 %v213_v11  ;;  %v260_v19 = vld [vmem:[%s1720_s28 + $0x1d8] sm:$0xff]  ;;  %v227_v22 = vld [vmem:[%s1720_s28 + $0xd0] sm:$0xff]  ;;  %p1826_p6 = scmp.lt.s32.totalorder %s1498_s25, 31 }
  0x34   : > { %843 = vmatpush.msra.mxu3 %v262_v13  ;;  %824 = vmatpush.msra.mxu2 %v245_v12  ;;  %v259_v23 = vld [vmem:[%s1720_s28 + $0x1d0] sm:$0xff]  ;;  %v210_v24 = vld [vmem:[%s1720_s28 + $0x48] sm:$0xff]  ;;  %v209_v28 = vld [vmem:[%s1720_s28 + $0x40] sm:$0xff] }
  0x35   : > { %804 = vmatpush.msra.mxu1 %v229_v14  ;;  %785 = vmatpush.msra.mxu0 %v212_v16  ;;  %v242_v25 = vld [vmem:[%s1720_s28 + $0x148] sm:$0xff]  ;;  %v241_v29 = vld [vmem:[%s1720_s28 + $0x140] sm:$0xff]  ;;  %v208_v32 = vld [vmem:[%s1720_s28 + $0x38] sm:$0xff]  ;;  %s2332_s25 = smov (!%p1826_p6, %s1498_s25), 31 }
  0x36   : > { %844 = vmatpush.msra.mxu3 %v261_v15  ;;  %825 = vmatpush.msra.mxu2 %v244_v17  ;;  %v226_v26 = vld [vmem:[%s1720_s28 + $0xc8] sm:$0xff]  ;;  %v225_v30 = vld [vmem:[%s1720_s28 + $0xc0] sm:$0xff]  ;;  %v240_v33 = vld [vmem:[%s1720_s28 + $0x138] sm:$0xff]  ;;  %s1853_s5 = scalar_lea.vmem %s2320_s1, %s2332_s25 }
  0x37   : > { %805 = vmatpush.msra.mxu1 %v228_v18  ;;  %786 = vmatpush.msra.mxu0 %v211_v20  ;;  %v258_v27 = vld [vmem:[%s1720_s28 + $0x1c8] sm:$0xff]  ;;  %v257_v31 = vld [vmem:[%s1720_s28 + $0x1c0] sm:$0xff]  ;;  %v224_v34 = vld [vmem:[%s1720_s28 + $0xb8] sm:$0xff] }
  0x38   : > { %845 = vmatpush.msra.mxu3 %v260_v19  ;;  %826 = vmatpush.msra.mxu2 %v243_v21  ;;  %v256_v35 = vld [vmem:[%s1720_s28 + $0x1b8] sm:$0xff]  ;;  %v207_v36 = vld [vmem:[%s1720_s28 + $0x30] sm:$0xff]  ;;  %v206_v40 = vld [vmem:[%s1720_s28 + $0x28] sm:$0xff] }
  0x39   : > { %806 = vmatpush.msra.mxu1 %v227_v22  ;;  %787 = vmatpush.msra.mxu0 %v210_v24  ;;  %v239_v37 = vld [vmem:[%s1720_s28 + $0x130] sm:$0xff]  ;;  %v238_v41 = vld [vmem:[%s1720_s28 + $0x128] sm:$0xff]  ;;  %v205_v44 = vld [vmem:[%s1720_s28 + $0x20] sm:$0xff] }
  0x3a   : > { %846 = vmatpush.msra.mxu3 %v259_v23  ;;  %827 = vmatpush.msra.mxu2 %v242_v25  ;;  %v223_v38 = vld [vmem:[%s1720_s28 + $0xb0] sm:$0xff]  ;;  %v222_v42 = vld [vmem:[%s1720_s28 + $0xa8] sm:$0xff]  ;;  %v237_v45 = vld [vmem:[%s1720_s28 + $0x120] sm:$0xff] }
  0x3b   : > { %807 = vmatpush.msra.mxu1 %v226_v26  ;;  %788 = vmatpush.msra.mxu0 %v209_v28  ;;  %v255_v39 = vld [vmem:[%s1720_s28 + $0x1b0] sm:$0xff]  ;;  %v254_v43 = vld [vmem:[%s1720_s28 + $0x1a8] sm:$0xff]  ;;  %v221_v46 = vld [vmem:[%s1720_s28 + $0xa0] sm:$0xff] }
  0x3c   : > { %847 = vmatpush.msra.mxu3 %v258_v27  ;;  %828 = vmatpush.msra.mxu2 %v241_v29  ;;  %v253_v47 = vld [vmem:[%s1720_s28 + $0x1a0] sm:$0xff]  ;;  %v204_v48 = vld [vmem:[%s1720_s28 + $0x18] sm:$0xff]  ;;  %v203_v52 = vld [vmem:[%s1720_s28 + $0x10] sm:$0xff] }
  0x3d   : > { %808 = vmatpush.msra.mxu1 %v225_v30  ;;  %789 = vmatpush.msra.mxu0 %v208_v32  ;;  %v236_v49 = vld [vmem:[%s1720_s28 + $0x118] sm:$0xff]  ;;  %v235_v53 = vld [vmem:[%s1720_s28 + $0x110] sm:$0xff]  ;;  %v202_v56 = vld [vmem:[%s1720_s28 + $0x8] sm:$0xff] }
  0x3e   : > { %848 = vmatpush.msra.mxu3 %v257_v31  ;;  %829 = vmatpush.msra.mxu2 %v240_v33  ;;  %v220_v50 = vld [vmem:[%s1720_s28 + $0x98] sm:$0xff]  ;;  %v219_v54 = vld [vmem:[%s1720_s28 + $0x90] sm:$0xff]  ;;  %v234_v57 = vld [vmem:[%s1720_s28 + $0x108] sm:$0xff] }
  0x3f   : > { %809 = vmatpush.msra.mxu1 %v224_v34  ;;  %790 = vmatpush.msra.mxu0 %v207_v36  ;;  %v252_v51 = vld [vmem:[%s1720_s28 + $0x198] sm:$0xff]  ;;  %v251_v55 = vld [vmem:[%s1720_s28 + $0x190] sm:$0xff]  ;;  %v218_v58 = vld [vmem:[%s1720_s28 + $0x88] sm:$0xff] }
  0x40   : > { %849 = vmatpush.msra.mxu3 %v256_v35  ;;  %830 = vmatpush.msra.mxu2 %v239_v37  ;;  %v250_v59 = vld [vmem:[%s1720_s28 + $0x188] sm:$0xff]  ;;  %v201_v60 = vld [vmem:[%s1720_s28] sm:$0xff]  ;;  %v280_v62 = vld [vmem:[%s1720_s28 + $0x278] sm:$0xff] }
  0x41   : > { %810 = vmatpush.msra.mxu1 %v223_v38  ;;  %791 = vmatpush.msra.mxu0 %v206_v40  ;;  %v233_v61 = vld [vmem:[%s1720_s28 + $0x100] sm:$0xff]  ;;  %v312_v63 = vld [vmem:[%s1720_s28 + $0x378] sm:$0xff]  ;;  %v279_v2 = vld [vmem:[%s1720_s28 + $0x270] sm:$0xff] }
  0x42   : > { %850 = vmatpush.msra.mxu3 %v255_v39  ;;  %831 = vmatpush.msra.mxu2 %v238_v41  ;;  %v217_v0 = vld [vmem:[%s1720_s28 + $0x80] sm:$0xff]  ;;  %v296_v3 = vld [vmem:[%s1720_s28 + $0x2f8] sm:$0xff]  ;;  %v311_v4 = vld [vmem:[%s1720_s28 + $0x370] sm:$0xff] }
  0x43   : > { %811 = vmatpush.msra.mxu1 %v222_v42  ;;  %792 = vmatpush.msra.mxu0 %v205_v44  ;;  %v249_v1 = vld [vmem:[%s1720_s28 + $0x180] sm:$0xff]  ;;  %v328_v5 = vld [vmem:[%s1720_s28 + $0x3f8] sm:$0xff]  ;;  %v278_v6 = vld [vmem:[%s1720_s28 + $0x268] sm:$0xff] }
  0x44   : > { %851 = vmatpush.msra.mxu3 %v254_v43  ;;  %832 = vmatpush.msra.mxu2 %v237_v45  ;;  %v295_v7 = vld [vmem:[%s1720_s28 + $0x2f0] sm:$0xff]  ;;  %v310_v8 = vld [vmem:[%s1720_s28 + $0x368] sm:$0xff]  ;;  %v277_v10 = vld [vmem:[%s1720_s28 + $0x260] sm:$0xff] }
  0x45   : > { %812 = vmatpush.msra.mxu1 %v221_v46  ;;  %793 = vmatpush.msra.mxu0 %v204_v48  ;;  %v327_v9 = vld [vmem:[%s1720_s28 + $0x3f0] sm:$0xff]  ;;  %v294_v11 = vld [vmem:[%s1720_s28 + $0x2e8] sm:$0xff]  ;;  %v309_v12 = vld [vmem:[%s1720_s28 + $0x360] sm:$0xff] }
  0x46   : > { %852 = vmatpush.msra.mxu3 %v253_v47  ;;  %833 = vmatpush.msra.mxu2 %v236_v49  ;;  %v326_v13 = vld [vmem:[%s1720_s28 + $0x3e8] sm:$0xff]  ;;  %v276_v14 = vld [vmem:[%s1720_s28 + $0x258] sm:$0xff]  ;;  %v293_v15 = vld [vmem:[%s1720_s28 + $0x2e0] sm:$0xff] }
  0x47   : > { %813 = vmatpush.msra.mxu1 %v220_v50  ;;  %794 = vmatpush.msra.mxu0 %v203_v52  ;;  %v308_v16 = vld [vmem:[%s1720_s28 + $0x358] sm:$0xff]  ;;  %v325_v17 = vld [vmem:[%s1720_s28 + $0x3e0] sm:$0xff]  ;;  %v275_v18 = vld [vmem:[%s1720_s28 + $0x250] sm:$0xff] }
  0x48   : > { %853 = vmatpush.msra.mxu3 %v252_v51  ;;  %834 = vmatpush.msra.mxu2 %v235_v53  ;;  %v292_v19 = vld [vmem:[%s1720_s28 + $0x2d8] sm:$0xff]  ;;  %v307_v20 = vld [vmem:[%s1720_s28 + $0x350] sm:$0xff]  ;;  %v274_v22 = vld [vmem:[%s1720_s28 + $0x248] sm:$0xff] }
  0x49   : > { %814 = vmatpush.msra.mxu1 %v219_v54  ;;  %795 = vmatpush.msra.mxu0 %v202_v56  ;;  %v324_v21 = vld [vmem:[%s1720_s28 + $0x3d8] sm:$0xff]  ;;  %v291_v23 = vld [vmem:[%s1720_s28 + $0x2d0] sm:$0xff]  ;;  %v306_v24 = vld [vmem:[%s1720_s28 + $0x348] sm:$0xff] }
  0x4a   : > { %854 = vmatpush.msra.mxu3 %v251_v55  ;;  %835 = vmatpush.msra.mxu2 %v234_v57  ;;  %v323_v25 = vld [vmem:[%s1720_s28 + $0x3d0] sm:$0xff]  ;;  %v273_v26 = vld [vmem:[%s1720_s28 + $0x240] sm:$0xff]  ;;  %v290_v27 = vld [vmem:[%s1720_s28 + $0x2c8] sm:$0xff] }
  0x4b   : > { %815 = vmatpush.msra.mxu1 %v218_v58  ;;  %796 = vmatpush.msra.mxu0 %v201_v60  ;;  %v305_v28 = vld [vmem:[%s1720_s28 + $0x340] sm:$0xff]  ;;  %v322_v29 = vld [vmem:[%s1720_s28 + $0x3c8] sm:$0xff]  ;;  %v272_v30 = vld [vmem:[%s1720_s28 + $0x238] sm:$0xff] }
  0x4c   : > { %855 = vmatpush.msra.mxu3 %v250_v59  ;;  %836 = vmatpush.msra.mxu2 %v233_v61  ;;  %v289_v31 = vld [vmem:[%s1720_s28 + $0x2c0] sm:$0xff]  ;;  %v304_v32 = vld [vmem:[%s1720_s28 + $0x338] sm:$0xff]  ;;  %v271_v34 = vld [vmem:[%s1720_s28 + $0x230] sm:$0xff] }
  0x4d   : > { %861 = vmatpush.msrb.mxu0 %v280_v62  ;;  %816 = vmatpush.msra.mxu1 %v217_v0  ;;  %v321_v33 = vld [vmem:[%s1720_s28 + $0x3c0] sm:$0xff]  ;;  %v288_v35 = vld [vmem:[%s1720_s28 + $0x2b8] sm:$0xff]  ;;  %v303_v36 = vld [vmem:[%s1720_s28 + $0x330] sm:$0xff] }
  0x4e   : > { %901 = vmatpush.msrb.mxu2 %v312_v63  ;;  %856 = vmatpush.msra.mxu3 %v249_v1  ;;  %v320_v37 = vld [vmem:[%s1720_s28 + $0x3b8] sm:$0xff]  ;;  %v270_v38 = vld [vmem:[%s1720_s28 + $0x228] sm:$0xff]  ;;  %v287_v39 = vld [vmem:[%s1720_s28 + $0x2b0] sm:$0xff] }
  0x4f   : > { %862 = vmatpush.msrb.mxu0 %v279_v2  ;;  %881 = vmatpush.msrb.mxu1 %v296_v3  ;;  %v302_v40 = vld [vmem:[%s1720_s28 + $0x328] sm:$0xff]  ;;  %v319_v41 = vld [vmem:[%s1720_s28 + $0x3b0] sm:$0xff]  ;;  %v269_v42 = vld [vmem:[%s1720_s28 + $0x220] sm:$0xff] }
  0x50   : > { %902 = vmatpush.msrb.mxu2 %v311_v4  ;;  %921 = vmatpush.msrb.mxu3 %v328_v5  ;;  %v286_v43 = vld [vmem:[%s1720_s28 + $0x2a8] sm:$0xff]  ;;  %v301_v44 = vld [vmem:[%s1720_s28 + $0x320] sm:$0xff]  ;;  %v268_v46 = vld [vmem:[%s1720_s28 + $0x218] sm:$0xff] }
  0x51   : > { %863 = vmatpush.msrb.mxu0 %v278_v6  ;;  %882 = vmatpush.msrb.mxu1 %v295_v7  ;;  %v318_v45 = vld [vmem:[%s1720_s28 + $0x3a8] sm:$0xff]  ;;  %v285_v47 = vld [vmem:[%s1720_s28 + $0x2a0] sm:$0xff]  ;;  %v300_v48 = vld [vmem:[%s1720_s28 + $0x318] sm:$0xff] }
  0x52   : > { %903 = vmatpush.msrb.mxu2 %v310_v8  ;;  %922 = vmatpush.msrb.mxu3 %v327_v9  ;;  %v317_v49 = vld [vmem:[%s1720_s28 + $0x3a0] sm:$0xff]  ;;  %v267_v50 = vld [vmem:[%s1720_s28 + $0x210] sm:$0xff]  ;;  %v284_v51 = vld [vmem:[%s1720_s28 + $0x298] sm:$0xff] }
  0x53   : > { %864 = vmatpush.msrb.mxu0 %v277_v10  ;;  %883 = vmatpush.msrb.mxu1 %v294_v11  ;;  %v1862_v52 = vld [vmem:[%s1853_s5] sm:$0xff]  ;;  %v299_v53 = vld [vmem:[%s1720_s28 + $0x310] sm:$0xff]  ;;  %v316_v54 = vld [vmem:[%s1720_s28 + $0x398] sm:$0xff] }
  0x54   : > { %904 = vmatpush.msrb.mxu2 %v309_v12  ;;  %923 = vmatpush.msrb.mxu3 %v326_v13  ;;  %v266_v55 = vld [vmem:[%s1720_s28 + $0x208] sm:$0xff]  ;;  %v283_v56 = vld [vmem:[%s1720_s28 + $0x290] sm:$0xff]  ;;  %v719_v59 = vperm.slane %v1862_v52, 2  ;;  %v265_v60 = vld [vmem:[%s1720_s28 + $0x200] sm:$0xff]  ;;  %v717_v63 = vperm.slane %v1862_v52, 0  ;;  %v720_v1 = vperm.slane %v1862_v52, 3 }
  0x55   : > { %865 = vmatpush.msrb.mxu0 %v276_v14  ;;  %884 = vmatpush.msrb.mxu1 %v293_v15  ;;  %v298_v57 = vld [vmem:[%s1720_s28 + $0x308] sm:$0xff]  ;;  %v315_v58 = vld [vmem:[%s1720_s28 + $0x390] sm:$0xff]  ;;  %v297_v62 = vld [vmem:[%s1720_s28 + $0x300] sm:$0xff]  ;;  %v718_v5 = vperm.slane %v1862_v52, 1  ;;  %v723_v15 = vperm.slane %v1862_v52, 6 }
  0x56   : > { %905 = vmatpush.msrb.mxu2 %v308_v16  ;;  %924 = vmatpush.msrb.mxu3 %v325_v17  ;;  %v282_v61 = vld [vmem:[%s1720_s28 + $0x288] sm:$0xff]  ;;  %v344_v2 = vld [vmem:[%s1720_s28 + $0x478] sm:$0xff]  ;;  %v281_v4 = vld [vmem:[%s1720_s28 + $0x280] sm:$0xff] }
  0x57   : > { %866 = vmatpush.msrb.mxu0 %v275_v18  ;;  %885 = vmatpush.msrb.mxu1 %v292_v19  ;;  %v314_v0 = vld [vmem:[%s1720_s28 + $0x388] sm:$0xff]  ;;  %v376_v3 = vld [vmem:[%s1720_s28 + $0x578] sm:$0xff]  ;;  %v313_v6 = vld [vmem:[%s1720_s28 + $0x380] sm:$0xff]  ;;  %v721_v19 = vperm.slane %v1862_v52, 4 }
  0x58   : > { %906 = vmatpush.msrb.mxu2 %v307_v20  ;;  %925 = vmatpush.msrb.mxu3 %v324_v21  ;;  %v343_v7 = vld [vmem:[%s1720_s28 + $0x470] sm:$0xff]  ;;  %v360_v8 = vld [vmem:[%s1720_s28 + $0x4f8] sm:$0xff]  ;;  %v342_v11 = vld [vmem:[%s1720_s28 + $0x468] sm:$0xff]  ;;  %v724_v21 = vperm.slane %v1862_v52, 7 }
  0x59   : > { %867 = vmatpush.msrb.mxu0 %v274_v22  ;;  %886 = vmatpush.msrb.mxu1 %v291_v23  ;;  %v375_v9 = vld [vmem:[%s1720_s28 + $0x570] sm:$0xff]  ;;  %v392_v10 = vld [vmem:[%s1720_s28 + $0x5f8] sm:$0xff]  ;;  %v374_v13 = vld [vmem:[%s1720_s28 + $0x568] sm:$0xff] }
  0x5a   : > { %907 = vmatpush.msrb.mxu2 %v306_v24  ;;  %926 = vmatpush.msrb.mxu3 %v323_v25  ;;  %v359_v12 = vld [vmem:[%s1720_s28 + $0x4f0] sm:$0xff]  ;;  %v341_v16 = vld [vmem:[%s1720_s28 + $0x460] sm:$0xff]  ;;  %v358_v17 = vld [vmem:[%s1720_s28 + $0x4e8] sm:$0xff]  ;;  %v722_v25 = vperm.slane %v1862_v52, 5 }
  0x5b   : > { %868 = vmatpush.msrb.mxu0 %v273_v26  ;;  %887 = vmatpush.msrb.mxu1 %v290_v27  ;;  %v391_v14 = vld [vmem:[%s1720_s28 + $0x5f0] sm:$0xff]  ;;  %v373_v18 = vld [vmem:[%s1720_s28 + $0x560] sm:$0xff]  ;;  %v390_v20 = vld [vmem:[%s1720_s28 + $0x5e8] sm:$0xff] }
  0x5c   : > { %908 = vmatpush.msrb.mxu2 %v305_v28  ;;  %927 = vmatpush.msrb.mxu3 %v322_v29  ;;  %v340_v22 = vld [vmem:[%s1720_s28 + $0x458] sm:$0xff]  ;;  %v357_v23 = vld [vmem:[%s1720_s28 + $0x4e0] sm:$0xff]  ;;  %v339_v27 = vld [vmem:[%s1720_s28 + $0x450] sm:$0xff] }
  0x5d   : > { %869 = vmatpush.msrb.mxu0 %v272_v30  ;;  %888 = vmatpush.msrb.mxu1 %v289_v31  ;;  %v372_v24 = vld [vmem:[%s1720_s28 + $0x558] sm:$0xff]  ;;  %v389_v26 = vld [vmem:[%s1720_s28 + $0x5e0] sm:$0xff]  ;;  %v371_v29 = vld [vmem:[%s1720_s28 + $0x550] sm:$0xff] }
  0x5e   : > { %909 = vmatpush.msrb.mxu2 %v304_v32  ;;  %928 = vmatpush.msrb.mxu3 %v321_v33  ;;  %v356_v28 = vld [vmem:[%s1720_s28 + $0x4d8] sm:$0xff]  ;;  %v338_v31 = vld [vmem:[%s1720_s28 + $0x448] sm:$0xff]  ;;  %v355_v32 = vld [vmem:[%s1720_s28 + $0x4d0] sm:$0xff] }
  0x5f   : > { %870 = vmatpush.msrb.mxu0 %v271_v34  ;;  %889 = vmatpush.msrb.mxu1 %v288_v35  ;;  %v388_v30 = vld [vmem:[%s1720_s28 + $0x5d8] sm:$0xff]  ;;  %v370_v33 = vld [vmem:[%s1720_s28 + $0x548] sm:$0xff]  ;;  %v387_v34 = vld [vmem:[%s1720_s28 + $0x5d0] sm:$0xff] }
  0x60   : > { %910 = vmatpush.msrb.mxu2 %v303_v36  ;;  %929 = vmatpush.msrb.mxu3 %v320_v37  ;;  %v337_v35 = vld [vmem:[%s1720_s28 + $0x440] sm:$0xff]  ;;  %v354_v36 = vld [vmem:[%s1720_s28 + $0x4c8] sm:$0xff] }
  0x61   : > { %871 = vmatpush.msrb.mxu0 %v270_v38  ;;  %890 = vmatpush.msrb.mxu1 %v287_v39  ;;  %v369_v37 = vld [vmem:[%s1720_s28 + $0x540] sm:$0xff]  ;;  %v386_v38 = vld [vmem:[%s1720_s28 + $0x5c8] sm:$0xff]  ;;  %v336_v39 = vld [vmem:[%s1720_s28 + $0x438] sm:$0xff] }
  0x62   : > { %911 = vmatpush.msrb.mxu2 %v302_v40  ;;  %930 = vmatpush.msrb.mxu3 %v319_v41  ;;  %v353_v40 = vld [vmem:[%s1720_s28 + $0x4c0] sm:$0xff]  ;;  %v368_v41 = vld [vmem:[%s1720_s28 + $0x538] sm:$0xff]  ;;  %v350_v52 = vld [vmem:[%s1720_s28 + $0x4a8] sm:$0xff] }
  0x63   : > { %872 = vmatpush.msrb.mxu0 %v269_v42  ;;  %891 = vmatpush.msrb.mxu1 %v286_v43  ;;  %v385_v42 = vld [vmem:[%s1720_s28 + $0x5c0] sm:$0xff]  ;;  %v335_v43 = vld [vmem:[%s1720_s28 + $0x430] sm:$0xff] }
  0x64   : > { %912 = vmatpush.msrb.mxu2 %v301_v44  ;;  %931 = vmatpush.msrb.mxu3 %v318_v45  ;;  %v352_v44 = vld [vmem:[%s1720_s28 + $0x4b8] sm:$0xff]  ;;  %v367_v45 = vld [vmem:[%s1720_s28 + $0x530] sm:$0xff] }
  0x65   : > { %873 = vmatpush.msrb.mxu0 %v268_v46  ;;  %892 = vmatpush.msrb.mxu1 %v285_v47  ;;  %v384_v46 = vld [vmem:[%s1720_s28 + $0x5b8] sm:$0xff]  ;;  %v334_v47 = vld [vmem:[%s1720_s28 + $0x428] sm:$0xff] }
  0x66   : > { %913 = vmatpush.msrb.mxu2 %v300_v48  ;;  %932 = vmatpush.msrb.mxu3 %v317_v49  ;;  %v351_v48 = vld [vmem:[%s1720_s28 + $0x4b0] sm:$0xff]  ;;  %v366_v49 = vld [vmem:[%s1720_s28 + $0x528] sm:$0xff] }
  0x67   : > { %874 = vmatpush.msrb.mxu0 %v267_v50  ;;  %893 = vmatpush.msrb.mxu1 %v284_v51  ;;  %v383_v50 = vld [vmem:[%s1720_s28 + $0x5b0] sm:$0xff]  ;;  %v333_v51 = vld [vmem:[%s1720_s28 + $0x420] sm:$0xff] }
  0x68   : > { %914 = vmatpush.msrb.mxu2 %v299_v53  ;;  %933 = vmatpush.msrb.mxu3 %v316_v54  ;;  %v365_v53 = vld [vmem:[%s1720_s28 + $0x520] sm:$0xff]  ;;  %v382_v54 = vld [vmem:[%s1720_s28 + $0x5a8] sm:$0xff] }
  0x69   : > { %875 = vmatpush.msrb.mxu0 %v266_v55  ;;  %894 = vmatpush.msrb.mxu1 %v283_v56  ;;  %v332_v55 = vld [vmem:[%s1720_s28 + $0x418] sm:$0xff]  ;;  %v349_v56 = vld [vmem:[%s1720_s28 + $0x4a0] sm:$0xff] }
  0x6a   : > { %915 = vmatpush.msrb.mxu2 %v298_v57  ;;  %934 = vmatpush.msrb.mxu3 %v315_v58  ;;  %v364_v57 = vld [vmem:[%s1720_s28 + $0x518] sm:$0xff]  ;;  %v381_v58 = vld [vmem:[%s1720_s28 + $0x5a0] sm:$0xff] }
  0x6b   : > { %837 = vmatmul.f32.vlgmr.msra.gmra.mxu2 %v719_v59  ;;  %876 = vmatpush.msrb.mxu0 %v265_v60  ;;  %v331_v59 = vld [vmem:[%s1720_s28 + $0x410] sm:$0xff]  ;;  %v348_v60 = vld [vmem:[%s1720_s28 + $0x498] sm:$0xff] }
  0x6c   : > { %895 = vmatpush.msrb.mxu1 %v282_v61  ;;  %916 = vmatpush.msrb.mxu2 %v297_v62  ;;  %v363_v61 = vld [vmem:[%s1720_s28 + $0x510] sm:$0xff]  ;;  %v380_v62 = vld [vmem:[%s1720_s28 + $0x598] sm:$0xff] }
  0x6d   : > { %935 = vmatpush.msrb.mxu3 %v314_v0  ;;  %797 = vmatmul.f32.vlgmr.msra.gmra.mxu0 %v717_v63  ;;  %v330_v63 = vld [vmem:[%s1720_s28 + $0x408] sm:$0xff]  ;;  %v347_v0 = vld [vmem:[%s1720_s28 + $0x490] sm:$0xff] }
  0x6e   : > { %857 = vmatmul.f32.vlgmr.msra.gmra.mxu3 %v720_v1  ;;  %941 = vmatpush.msra.mxu0 %v344_v2  ;;  %v1941_v1 = vld [vmem:[%s1853_s5 + $0x8] sm:$0xff] }
  0x6f   : > { %981 = vmatpush.msra.mxu2 %v376_v3  ;;  %896 = vmatpush.msrb.mxu1 %v281_v4  ;;  %v362_v2 = vld [vmem:[%s1720_s28 + $0x508] sm:$0xff]  ;;  %v379_v3 = vld [vmem:[%s1720_s28 + $0x590] sm:$0xff]  ;;  %v329_v4 = vld [vmem:[%s1720_s28 + $0x400] sm:$0xff] }
  0x70   : > { %936 = vmatpush.msrb.mxu3 %v313_v6  ;;  %817 = vmatmul.f32.vlgmr.msra.gmra.mxu1 %v718_v5  ;;  %v346_v5 = vld [vmem:[%s1720_s28 + $0x488] sm:$0xff]  ;;  %v361_v6 = vld [vmem:[%s1720_s28 + $0x500] sm:$0xff] }
  0x71   : > { %942 = vmatpush.msra.mxu0 %v343_v7  ;;  %961 = vmatpush.msra.mxu1 %v360_v8  ;;  %v378_v7 = vld [vmem:[%s1720_s28 + $0x588] sm:$0xff]  ;;  %v725_v8 = vperm.slane %v1941_v1, 0 }
  0x72   : > { %982 = vmatpush.msra.mxu2 %v375_v9  ;;  %1001 = vmatpush.msra.mxu3 %v392_v10  ;;  %v727_v9 = vperm.slane %v1941_v1, 2  ;;  %v408_v10 = vld [vmem:[%s1720_s28 + $0x678] sm:$0xff] }
  0x73   : > { %943 = vmatpush.msra.mxu0 %v342_v11  ;;  %962 = vmatpush.msra.mxu1 %v359_v12  ;;  %v440_v11 = vld [vmem:[%s1720_s28 + $0x778] sm:$0xff]  ;;  %v345_v12 = vld [vmem:[%s1720_s28 + $0x480] sm:$0xff] }
  0x74   : > { %983 = vmatpush.msra.mxu2 %v374_v13  ;;  %1002 = vmatpush.msra.mxu3 %v391_v14  ;;  %v377_v13 = vld [vmem:[%s1720_s28 + $0x580] sm:$0xff]  ;;  %v726_v14 = vperm.slane %v1941_v1, 1 }
  0x75   : > { %917 = vmatmul.f32.vlgmr.msrb.gmra.mxu2 %v723_v15  ;;  %944 = vmatpush.msra.mxu0 %v341_v16  ;;  %v728_v15 = vperm.slane %v1941_v1, 3  ;;  %v407_v16 = vld [vmem:[%s1720_s28 + $0x670] sm:$0xff] }
  0x76   : > { %963 = vmatpush.msra.mxu1 %v358_v17  ;;  %984 = vmatpush.msra.mxu2 %v373_v18  ;;  %v424_v17 = vld [vmem:[%s1720_s28 + $0x6f8] sm:$0xff]  ;;  %v439_v18 = vld [vmem:[%s1720_s28 + $0x770] sm:$0xff] }
  0x77   : > { %1003 = vmatpush.msra.mxu3 %v390_v20  ;;  %877 = vmatmul.f32.vlgmr.msrb.gmra.mxu0 %v721_v19  ;;  %v456_v19 = vld [vmem:[%s1720_s28 + $0x7f8] sm:$0xff]  ;;  %v406_v20 = vld [vmem:[%s1720_s28 + $0x668] sm:$0xff] }
  0x78   : > { %937 = vmatmul.f32.vlgmr.msrb.gmra.mxu3 %v724_v21  ;;  %945 = vmatpush.msra.mxu0 %v340_v22  ;;  %v423_v21 = vld [vmem:[%s1720_s28 + $0x6f0] sm:$0xff]  ;;  %v438_v22 = vld [vmem:[%s1720_s28 + $0x768] sm:$0xff] }
  0x79   : > { %964 = vmatpush.msra.mxu1 %v357_v23  ;;  %985 = vmatpush.msra.mxu2 %v372_v24  ;;  %v455_v23 = vld [vmem:[%s1720_s28 + $0x7f0] sm:$0xff]  ;;  %v405_v24 = vld [vmem:[%s1720_s28 + $0x660] sm:$0xff] }
  0x7a   : > { %1004 = vmatpush.msra.mxu3 %v389_v26  ;;  %897 = vmatmul.f32.vlgmr.msrb.gmra.mxu1 %v722_v25  ;;  %v422_v25 = vld [vmem:[%s1720_s28 + $0x6e8] sm:$0xff]  ;;  %v437_v26 = vld [vmem:[%s1720_s28 + $0x760] sm:$0xff] }
  0x7b   : > { %946 = vmatpush.msra.mxu0 %v339_v27  ;;  %965 = vmatpush.msra.mxu1 %v356_v28  ;;  %v454_v27 = vld [vmem:[%s1720_s28 + $0x7e8] sm:$0xff]  ;;  %v404_v28 = vld [vmem:[%s1720_s28 + $0x658] sm:$0xff] }
  0x7c   : > { %986 = vmatpush.msra.mxu2 %v371_v29  ;;  %1005 = vmatpush.msra.mxu3 %v388_v30  ;;  %v421_v29 = vld [vmem:[%s1720_s28 + $0x6e0] sm:$0xff]  ;;  %v436_v30 = vld [vmem:[%s1720_s28 + $0x758] sm:$0xff] }
  0x7d   : > { %947 = vmatpush.msra.mxu0 %v338_v31  ;;  %966 = vmatpush.msra.mxu1 %v355_v32  ;;  %v453_v31 = vld [vmem:[%s1720_s28 + $0x7e0] sm:$0xff]  ;;  %v403_v32 = vld [vmem:[%s1720_s28 + $0x650] sm:$0xff] }
  0x7e   : > { %987 = vmatpush.msra.mxu2 %v370_v33  ;;  %1006 = vmatpush.msra.mxu3 %v387_v34  ;;  %v420_v33 = vld [vmem:[%s1720_s28 + $0x6d8] sm:$0xff]  ;;  %v435_v34 = vld [vmem:[%s1720_s28 + $0x750] sm:$0xff] }
  0x7f   : > { %948 = vmatpush.msra.mxu0 %v337_v35  ;;  %967 = vmatpush.msra.mxu1 %v354_v36  ;;  %v452_v35 = vld [vmem:[%s1720_s28 + $0x7d8] sm:$0xff]  ;;  %v402_v36 = vld [vmem:[%s1720_s28 + $0x648] sm:$0xff] }
  0x80   : > { %988 = vmatpush.msra.mxu2 %v369_v37  ;;  %1007 = vmatpush.msra.mxu3 %v386_v38  ;;  %v419_v37 = vld [vmem:[%s1720_s28 + $0x6d0] sm:$0xff]  ;;  %v434_v38 = vld [vmem:[%s1720_s28 + $0x748] sm:$0xff] }
  0x81   : > { %949 = vmatpush.msra.mxu0 %v336_v39  ;;  %968 = vmatpush.msra.mxu1 %v353_v40  ;;  %v451_v39 = vld [vmem:[%s1720_s28 + $0x7d0] sm:$0xff]  ;;  %v401_v40 = vld [vmem:[%s1720_s28 + $0x640] sm:$0xff] }
  0x82   : > { %989 = vmatpush.msra.mxu2 %v368_v41  ;;  %1008 = vmatpush.msra.mxu3 %v385_v42  ;;  %v418_v41 = vld [vmem:[%s1720_s28 + $0x6c8] sm:$0xff]  ;;  %v433_v42 = vld [vmem:[%s1720_s28 + $0x740] sm:$0xff] }
  0x83   : > { %950 = vmatpush.msra.mxu0 %v335_v43  ;;  %969 = vmatpush.msra.mxu1 %v352_v44  ;;  %v450_v43 = vld [vmem:[%s1720_s28 + $0x7c8] sm:$0xff]  ;;  %v400_v44 = vld [vmem:[%s1720_s28 + $0x638] sm:$0xff] }
  0x84   : > { %990 = vmatpush.msra.mxu2 %v367_v45  ;;  %1009 = vmatpush.msra.mxu3 %v384_v46  ;;  %v417_v45 = vld [vmem:[%s1720_s28 + $0x6c0] sm:$0xff]  ;;  %v432_v46 = vld [vmem:[%s1720_s28 + $0x738] sm:$0xff] }
  0x85   : > { %951 = vmatpush.msra.mxu0 %v334_v47  ;;  %970 = vmatpush.msra.mxu1 %v351_v48  ;;  %v449_v47 = vld [vmem:[%s1720_s28 + $0x7c0] sm:$0xff]  ;;  %v399_v48 = vld [vmem:[%s1720_s28 + $0x630] sm:$0xff] }
  0x86   : > { %991 = vmatpush.msra.mxu2 %v366_v49  ;;  %1010 = vmatpush.msra.mxu3 %v383_v50  ;;  %v416_v49 = vld [vmem:[%s1720_s28 + $0x6b8] sm:$0xff]  ;;  %v431_v50 = vld [vmem:[%s1720_s28 + $0x730] sm:$0xff] }
  0x87   : > { %952 = vmatpush.msra.mxu0 %v333_v51  ;;  %971 = vmatpush.msra.mxu1 %v350_v52  ;;  %v448_v51 = vld [vmem:[%s1720_s28 + $0x7b8] sm:$0xff]  ;;  %v398_v52 = vld [vmem:[%s1720_s28 + $0x628] sm:$0xff] }
  0x88   : > { %992 = vmatpush.msra.mxu2 %v365_v53  ;;  %1011 = vmatpush.msra.mxu3 %v382_v54  ;;  %v415_v53 = vld [vmem:[%s1720_s28 + $0x6b0] sm:$0xff]  ;;  %v430_v54 = vld [vmem:[%s1720_s28 + $0x728] sm:$0xff] }
  0x89   : > { %953 = vmatpush.msra.mxu0 %v332_v55  ;;  %972 = vmatpush.msra.mxu1 %v349_v56  ;;  %v447_v55 = vld [vmem:[%s1720_s28 + $0x7b0] sm:$0xff]  ;;  %v397_v56 = vld [vmem:[%s1720_s28 + $0x620] sm:$0xff] }
  0x8a   : > { %993 = vmatpush.msra.mxu2 %v364_v57  ;;  %1012 = vmatpush.msra.mxu3 %v381_v58  ;;  %v414_v57 = vld [vmem:[%s1720_s28 + $0x6a8] sm:$0xff]  ;;  %v429_v58 = vld [vmem:[%s1720_s28 + $0x720] sm:$0xff] }
  0x8b   : > { %954 = vmatpush.msra.mxu0 %v331_v59  ;;  %973 = vmatpush.msra.mxu1 %v348_v60  ;;  %v446_v59 = vld [vmem:[%s1720_s28 + $0x7a8] sm:$0xff]  ;;  %v396_v60 = vld [vmem:[%s1720_s28 + $0x618] sm:$0xff] }
  0x8c   : > { %994 = vmatpush.msra.mxu2 %v363_v61  ;;  %1013 = vmatpush.msra.mxu3 %v380_v62  ;;  %v413_v61 = vld [vmem:[%s1720_s28 + $0x6a0] sm:$0xff]  ;;  %v428_v62 = vld [vmem:[%s1720_s28 + $0x718] sm:$0xff] }
  0x8d   : > { %955 = vmatpush.msra.mxu0 %v330_v63  ;;  %974 = vmatpush.msra.mxu1 %v347_v0  ;;  %v445_v63 = vld [vmem:[%s1720_s28 + $0x7a0] sm:$0xff]  ;;  %v395_v0 = vld [vmem:[%s1720_s28 + $0x610] sm:$0xff] }
  0x8e   : > { %995 = vmatpush.msra.mxu2 %v362_v2  ;;  %1014 = vmatpush.msra.mxu3 %v379_v3  ;;  %v412_v2 = vld [vmem:[%s1720_s28 + $0x698] sm:$0xff]  ;;  %v427_v3 = vld [vmem:[%s1720_s28 + $0x710] sm:$0xff] }
  0x8f   : > { %956 = vmatpush.msra.mxu0 %v329_v4  ;;  %975 = vmatpush.msra.mxu1 %v346_v5  ;;  %v444_v4 = vld [vmem:[%s1720_s28 + $0x798] sm:$0xff]  ;;  %v394_v5 = vld [vmem:[%s1720_s28 + $0x608] sm:$0xff] }
  0x90   : > { %996 = vmatpush.msra.mxu2 %v361_v6  ;;  %1015 = vmatpush.msra.mxu3 %v378_v7  ;;  %v411_v6 = vld [vmem:[%s1720_s28 + $0x690] sm:$0xff]  ;;  %v426_v7 = vld [vmem:[%s1720_s28 + $0x708] sm:$0xff] }
  0x91   : > { %957 = vmatmul.f32.vlgmr.msra.gmra.mxu0 %v725_v8  ;;  %997 = vmatmul.f32.vlgmr.msra.gmra.mxu2 %v727_v9  ;;  %v443_v8 = vld [vmem:[%s1720_s28 + $0x790] sm:$0xff]  ;;  %v393_v9 = vld [vmem:[%s1720_s28 + $0x600] sm:$0xff] }
  0x92   : > { %1021 = vmatpush.msrb.mxu0 %v408_v10  ;;  %1061 = vmatpush.msrb.mxu2 %v440_v11  ;;  %v410_v10 = vld [vmem:[%s1720_s28 + $0x688] sm:$0xff]  ;;  %v425_v11 = vld [vmem:[%s1720_s28 + $0x700] sm:$0xff] }
  0x93   : > { %976 = vmatpush.msra.mxu1 %v345_v12  ;;  %1016 = vmatpush.msra.mxu3 %v377_v13  ;;  %v442_v12 = vld [vmem:[%s1720_s28 + $0x788] sm:$0xff]  ;;  %v729_v13 = vperm.slane %v1941_v1, 4 }
  0x94   : > { %977 = vmatmul.f32.vlgmr.msra.gmra.mxu1 %v726_v14  ;;  %1017 = vmatmul.f32.vlgmr.msra.gmra.mxu3 %v728_v15  ;;  %v731_v14 = vperm.slane %v1941_v1, 6  ;;  %v472_v15 = vld [vmem:[%s1720_s28 + $0x878] sm:$0xff] }
  0x95   : > { %1022 = vmatpush.msrb.mxu0 %v407_v16  ;;  %1041 = vmatpush.msrb.mxu1 %v424_v17  ;;  %v504_v16 = vld [vmem:[%s1720_s28 + $0x978] sm:$0xff]  ;;  %v409_v17 = vld [vmem:[%s1720_s28 + $0x680] sm:$0xff] }
  0x96   : > { %1062 = vmatpush.msrb.mxu2 %v439_v18  ;;  %1081 = vmatpush.msrb.mxu3 %v456_v19  ;;  %v441_v18 = vld [vmem:[%s1720_s28 + $0x780] sm:$0xff]  ;;  %v730_v19 = vperm.slane %v1941_v1, 5 }
  0x97   : > { %1023 = vmatpush.msrb.mxu0 %v406_v20  ;;  %1042 = vmatpush.msrb.mxu1 %v423_v21  ;;  %v732_v20 = vperm.slane %v1941_v1, 7  ;;  %v471_v21 = vld [vmem:[%s1720_s28 + $0x870] sm:$0xff] }
  0x98   : > { %1063 = vmatpush.msrb.mxu2 %v438_v22  ;;  %1082 = vmatpush.msrb.mxu3 %v455_v23  ;;  %v488_v22 = vld [vmem:[%s1720_s28 + $0x8f8] sm:$0xff]  ;;  %v503_v23 = vld [vmem:[%s1720_s28 + $0x970] sm:$0xff] }
  0x99   : > { %1024 = vmatpush.msrb.mxu0 %v405_v24  ;;  %1043 = vmatpush.msrb.mxu1 %v422_v25  ;;  %v520_v24 = vld [vmem:[%s1720_s28 + $0x9f8] sm:$0xff]  ;;  %v470_v25 = vld [vmem:[%s1720_s28 + $0x868] sm:$0xff]  ;;  %v487_v1 = vld [vmem:[%s1720_s28 + $0x8f0] sm:$0xff] }
  0x9a   : > { %1064 = vmatpush.msrb.mxu2 %v437_v26  ;;  %1083 = vmatpush.msrb.mxu3 %v454_v27  ;;  %v502_v26 = vld [vmem:[%s1720_s28 + $0x968] sm:$0xff]  ;;  %v519_v27 = vld [vmem:[%s1720_s28 + $0x9f0] sm:$0xff] }
  0x9b   : > { %1025 = vmatpush.msrb.mxu0 %v404_v28  ;;  %1044 = vmatpush.msrb.mxu1 %v421_v29  ;;  %v469_v28 = vld [vmem:[%s1720_s28 + $0x860] sm:$0xff]  ;;  %v486_v29 = vld [vmem:[%s1720_s28 + $0x8e8] sm:$0xff] }
  0x9c   : > { %1065 = vmatpush.msrb.mxu2 %v436_v30  ;;  %1084 = vmatpush.msrb.mxu3 %v453_v31  ;;  %v501_v30 = vld [vmem:[%s1720_s28 + $0x960] sm:$0xff]  ;;  %v518_v31 = vld [vmem:[%s1720_s28 + $0x9e8] sm:$0xff] }
  0x9d   : > { %1026 = vmatpush.msrb.mxu0 %v403_v32  ;;  %1045 = vmatpush.msrb.mxu1 %v420_v33  ;;  %v468_v32 = vld [vmem:[%s1720_s28 + $0x858] sm:$0xff]  ;;  %v485_v33 = vld [vmem:[%s1720_s28 + $0x8e0] sm:$0xff] }
  0x9e   : > { %1066 = vmatpush.msrb.mxu2 %v435_v34  ;;  %1085 = vmatpush.msrb.mxu3 %v452_v35  ;;  %v500_v34 = vld [vmem:[%s1720_s28 + $0x958] sm:$0xff]  ;;  %v517_v35 = vld [vmem:[%s1720_s28 + $0x9e0] sm:$0xff] }
  0x9f   : > { %1027 = vmatpush.msrb.mxu0 %v402_v36  ;;  %1046 = vmatpush.msrb.mxu1 %v419_v37  ;;  %v467_v36 = vld [vmem:[%s1720_s28 + $0x850] sm:$0xff]  ;;  %v484_v37 = vld [vmem:[%s1720_s28 + $0x8d8] sm:$0xff] }
  0xa0   : > { %1067 = vmatpush.msrb.mxu2 %v434_v38  ;;  %1086 = vmatpush.msrb.mxu3 %v451_v39  ;;  %v499_v38 = vld [vmem:[%s1720_s28 + $0x950] sm:$0xff]  ;;  %v516_v39 = vld [vmem:[%s1720_s28 + $0x9d8] sm:$0xff] }
  0xa1   : > { %1028 = vmatpush.msrb.mxu0 %v401_v40  ;;  %1047 = vmatpush.msrb.mxu1 %v418_v41  ;;  %v466_v40 = vld [vmem:[%s1720_s28 + $0x848] sm:$0xff]  ;;  %v483_v41 = vld [vmem:[%s1720_s28 + $0x8d0] sm:$0xff] }
  0xa2   : > { %1068 = vmatpush.msrb.mxu2 %v433_v42  ;;  %1087 = vmatpush.msrb.mxu3 %v450_v43  ;;  %v498_v42 = vld [vmem:[%s1720_s28 + $0x948] sm:$0xff]  ;;  %v515_v43 = vld [vmem:[%s1720_s28 + $0x9d0] sm:$0xff] }
  0xa3   : > { %1029 = vmatpush.msrb.mxu0 %v400_v44  ;;  %1048 = vmatpush.msrb.mxu1 %v417_v45  ;;  %v465_v44 = vld [vmem:[%s1720_s28 + $0x840] sm:$0xff]  ;;  %v482_v45 = vld [vmem:[%s1720_s28 + $0x8c8] sm:$0xff] }
  0xa4   : > { %1069 = vmatpush.msrb.mxu2 %v432_v46  ;;  %1088 = vmatpush.msrb.mxu3 %v449_v47  ;;  %v497_v46 = vld [vmem:[%s1720_s28 + $0x940] sm:$0xff]  ;;  %v514_v47 = vld [vmem:[%s1720_s28 + $0x9c8] sm:$0xff] }
  0xa5   : > { %1030 = vmatpush.msrb.mxu0 %v399_v48  ;;  %1049 = vmatpush.msrb.mxu1 %v416_v49  ;;  %v464_v48 = vld [vmem:[%s1720_s28 + $0x838] sm:$0xff]  ;;  %v481_v49 = vld [vmem:[%s1720_s28 + $0x8c0] sm:$0xff] }
  0xa6   : > { %1070 = vmatpush.msrb.mxu2 %v431_v50  ;;  %1089 = vmatpush.msrb.mxu3 %v448_v51  ;;  %v496_v50 = vld [vmem:[%s1720_s28 + $0x938] sm:$0xff]  ;;  %v513_v51 = vld [vmem:[%s1720_s28 + $0x9c0] sm:$0xff] }
  0xa7   : > { %1031 = vmatpush.msrb.mxu0 %v398_v52  ;;  %1050 = vmatpush.msrb.mxu1 %v415_v53  ;;  %v463_v52 = vld [vmem:[%s1720_s28 + $0x830] sm:$0xff]  ;;  %v480_v53 = vld [vmem:[%s1720_s28 + $0x8b8] sm:$0xff] }
  0xa8   : > { %1071 = vmatpush.msrb.mxu2 %v430_v54  ;;  %1090 = vmatpush.msrb.mxu3 %v447_v55  ;;  %v495_v54 = vld [vmem:[%s1720_s28 + $0x930] sm:$0xff]  ;;  %v512_v55 = vld [vmem:[%s1720_s28 + $0x9b8] sm:$0xff] }
  0xa9   : > { %1032 = vmatpush.msrb.mxu0 %v397_v56  ;;  %1051 = vmatpush.msrb.mxu1 %v414_v57  ;;  %v462_v56 = vld [vmem:[%s1720_s28 + $0x828] sm:$0xff]  ;;  %v479_v57 = vld [vmem:[%s1720_s28 + $0x8b0] sm:$0xff] }
  0xaa   : > { %1072 = vmatpush.msrb.mxu2 %v429_v58  ;;  %1091 = vmatpush.msrb.mxu3 %v446_v59  ;;  %v494_v58 = vld [vmem:[%s1720_s28 + $0x928] sm:$0xff]  ;;  %v511_v59 = vld [vmem:[%s1720_s28 + $0x9b0] sm:$0xff] }
  0xab   : > { %1033 = vmatpush.msrb.mxu0 %v396_v60  ;;  %1052 = vmatpush.msrb.mxu1 %v413_v61  ;;  %v461_v60 = vld [vmem:[%s1720_s28 + $0x820] sm:$0xff]  ;;  %v478_v61 = vld [vmem:[%s1720_s28 + $0x8a8] sm:$0xff] }
  0xac   : > { %1073 = vmatpush.msrb.mxu2 %v428_v62  ;;  %1092 = vmatpush.msrb.mxu3 %v445_v63  ;;  %v493_v62 = vld [vmem:[%s1720_s28 + $0x920] sm:$0xff]  ;;  %v510_v63 = vld [vmem:[%s1720_s28 + $0x9a8] sm:$0xff] }
  0xad   : > { %1034 = vmatpush.msrb.mxu0 %v395_v0  ;;  %1053 = vmatpush.msrb.mxu1 %v412_v2  ;;  %v460_v0 = vld [vmem:[%s1720_s28 + $0x818] sm:$0xff]  ;;  %v477_v2 = vld [vmem:[%s1720_s28 + $0x8a0] sm:$0xff] }
  0xae   : > { %1074 = vmatpush.msrb.mxu2 %v427_v3  ;;  %1093 = vmatpush.msrb.mxu3 %v444_v4  ;;  %v492_v3 = vld [vmem:[%s1720_s28 + $0x918] sm:$0xff]  ;;  %v509_v4 = vld [vmem:[%s1720_s28 + $0x9a0] sm:$0xff] }
  0xaf   : > { %1035 = vmatpush.msrb.mxu0 %v394_v5  ;;  %1054 = vmatpush.msrb.mxu1 %v411_v6  ;;  %v459_v5 = vld [vmem:[%s1720_s28 + $0x810] sm:$0xff]  ;;  %v476_v6 = vld [vmem:[%s1720_s28 + $0x898] sm:$0xff] }
  0xb0   : > { %1075 = vmatpush.msrb.mxu2 %v426_v7  ;;  %1094 = vmatpush.msrb.mxu3 %v443_v8  ;;  %v491_v7 = vld [vmem:[%s1720_s28 + $0x910] sm:$0xff]  ;;  %v508_v8 = vld [vmem:[%s1720_s28 + $0x998] sm:$0xff] }
  0xb1   : > { %1036 = vmatpush.msrb.mxu0 %v393_v9  ;;  %1055 = vmatpush.msrb.mxu1 %v410_v10  ;;  %v458_v9 = vld [vmem:[%s1720_s28 + $0x808] sm:$0xff]  ;;  %v475_v10 = vld [vmem:[%s1720_s28 + $0x890] sm:$0xff] }
  0xb2   : > { %1076 = vmatpush.msrb.mxu2 %v425_v11  ;;  %1095 = vmatpush.msrb.mxu3 %v442_v12  ;;  %v2080_v11 = vld [vmem:[%s1853_s5 + $0x10] sm:$0xff]  ;;  %v490_v12 = vld [vmem:[%s1720_s28 + $0x908] sm:$0xff] }
  0xb3   : > { %1037 = vmatmul.f32.vlgmr.msrb.gmra.mxu0 %v729_v13  ;;  %1077 = vmatmul.f32.vlgmr.msrb.gmra.mxu2 %v731_v14  ;;  %v507_v13 = vld [vmem:[%s1720_s28 + $0x990] sm:$0xff]  ;;  %v457_v14 = vld [vmem:[%s1720_s28 + $0x800] sm:$0xff] }
  0xb4   : > { %1101 = vmatpush.msra.mxu0 %v472_v15  ;;  %1141 = vmatpush.msra.mxu2 %v504_v16  ;;  %v474_v15 = vld [vmem:[%s1720_s28 + $0x888] sm:$0xff]  ;;  %v489_v16 = vld [vmem:[%s1720_s28 + $0x900] sm:$0xff] }
  0xb5   : > { %1056 = vmatpush.msrb.mxu1 %v409_v17  ;;  %1096 = vmatpush.msrb.mxu3 %v441_v18  ;;  %v506_v17 = vld [vmem:[%s1720_s28 + $0x988] sm:$0xff]  ;;  %v733_v18 = vperm.slane %v2080_v11, 0 }
  0xb6   : > { %1057 = vmatmul.f32.vlgmr.msrb.gmra.mxu1 %v730_v19  ;;  %1097 = vmatmul.f32.vlgmr.msrb.gmra.mxu3 %v732_v20  ;;  %v735_v19 = vperm.slane %v2080_v11, 2  ;;  %v536_v20 = vld [vmem:[%s1720_s28 + $0xa78] sm:$0xff] }
  0xb7   : > { %1102 = vmatpush.msra.mxu0 %v471_v21  ;;  %1121 = vmatpush.msra.mxu1 %v488_v22  ;;  %v568_v21 = vld [vmem:[%s1720_s28 + $0xb78] sm:$0xff]  ;;  %v473_v22 = vld [vmem:[%s1720_s28 + $0x880] sm:$0xff] }
  0xb8   : > { %1142 = vmatpush.msra.mxu2 %v503_v23  ;;  %1161 = vmatpush.msra.mxu3 %v520_v24  ;;  %v505_v23 = vld [vmem:[%s1720_s28 + $0x980] sm:$0xff]  ;;  %v734_v24 = vperm.slane %v2080_v11, 1 }
  0xb9   : > { %1103 = vmatpush.msra.mxu0 %v470_v25  ;;  %1122 = vmatpush.msra.mxu1 %v487_v1  ;;  %v736_v25 = vperm.slane %v2080_v11, 3  ;;  %v535_v1 = vld [vmem:[%s1720_s28 + $0xa70] sm:$0xff] }
  0xba   : > { %1143 = vmatpush.msra.mxu2 %v502_v26  ;;  %1162 = vmatpush.msra.mxu3 %v519_v27  ;;  %v552_v26 = vld [vmem:[%s1720_s28 + $0xaf8] sm:$0xff]  ;;  %v567_v27 = vld [vmem:[%s1720_s28 + $0xb70] sm:$0xff] }
  0xbb   : > { %1104 = vmatpush.msra.mxu0 %v469_v28  ;;  %1123 = vmatpush.msra.mxu1 %v486_v29  ;;  %v584_v28 = vld [vmem:[%s1720_s28 + $0xbf8] sm:$0xff]  ;;  %v534_v29 = vld [vmem:[%s1720_s28 + $0xa68] sm:$0xff] }
  0xbc   : > { %1144 = vmatpush.msra.mxu2 %v501_v30  ;;  %1163 = vmatpush.msra.mxu3 %v518_v31  ;;  %v551_v30 = vld [vmem:[%s1720_s28 + $0xaf0] sm:$0xff]  ;;  %v566_v31 = vld [vmem:[%s1720_s28 + $0xb68] sm:$0xff] }
  0xbd   : > { %1105 = vmatpush.msra.mxu0 %v468_v32  ;;  %1124 = vmatpush.msra.mxu1 %v485_v33  ;;  %v583_v32 = vld [vmem:[%s1720_s28 + $0xbf0] sm:$0xff]  ;;  %v533_v33 = vld [vmem:[%s1720_s28 + $0xa60] sm:$0xff] }
  0xbe   : > { %1145 = vmatpush.msra.mxu2 %v500_v34  ;;  %1164 = vmatpush.msra.mxu3 %v517_v35  ;;  %v550_v34 = vld [vmem:[%s1720_s28 + $0xae8] sm:$0xff]  ;;  %v565_v35 = vld [vmem:[%s1720_s28 + $0xb60] sm:$0xff] }
  0xbf   : > { %1106 = vmatpush.msra.mxu0 %v467_v36  ;;  %1125 = vmatpush.msra.mxu1 %v484_v37  ;;  %v582_v36 = vld [vmem:[%s1720_s28 + $0xbe8] sm:$0xff]  ;;  %v532_v37 = vld [vmem:[%s1720_s28 + $0xa58] sm:$0xff] }
  0xc0   : > { %1146 = vmatpush.msra.mxu2 %v499_v38  ;;  %1165 = vmatpush.msra.mxu3 %v516_v39  ;;  %v549_v38 = vld [vmem:[%s1720_s28 + $0xae0] sm:$0xff]  ;;  %v564_v39 = vld [vmem:[%s1720_s28 + $0xb58] sm:$0xff] }
  0xc1   : > { %1107 = vmatpush.msra.mxu0 %v466_v40  ;;  %1126 = vmatpush.msra.mxu1 %v483_v41  ;;  %v581_v40 = vld [vmem:[%s1720_s28 + $0xbe0] sm:$0xff]  ;;  %v531_v41 = vld [vmem:[%s1720_s28 + $0xa50] sm:$0xff] }
  0xc2   : > { %1147 = vmatpush.msra.mxu2 %v498_v42  ;;  %1166 = vmatpush.msra.mxu3 %v515_v43  ;;  %v548_v42 = vld [vmem:[%s1720_s28 + $0xad8] sm:$0xff]  ;;  %v563_v43 = vld [vmem:[%s1720_s28 + $0xb50] sm:$0xff] }
  0xc3   : > { %1108 = vmatpush.msra.mxu0 %v465_v44  ;;  %1127 = vmatpush.msra.mxu1 %v482_v45  ;;  %v580_v44 = vld [vmem:[%s1720_s28 + $0xbd8] sm:$0xff]  ;;  %v530_v45 = vld [vmem:[%s1720_s28 + $0xa48] sm:$0xff] }
  0xc4   : > { %1148 = vmatpush.msra.mxu2 %v497_v46  ;;  %1167 = vmatpush.msra.mxu3 %v514_v47  ;;  %v547_v46 = vld [vmem:[%s1720_s28 + $0xad0] sm:$0xff]  ;;  %v562_v47 = vld [vmem:[%s1720_s28 + $0xb48] sm:$0xff] }
  0xc5   : > { %1109 = vmatpush.msra.mxu0 %v464_v48  ;;  %1128 = vmatpush.msra.mxu1 %v481_v49  ;;  %v579_v48 = vld [vmem:[%s1720_s28 + $0xbd0] sm:$0xff]  ;;  %v529_v49 = vld [vmem:[%s1720_s28 + $0xa40] sm:$0xff] }
  0xc6   : > { %1149 = vmatpush.msra.mxu2 %v496_v50  ;;  %1168 = vmatpush.msra.mxu3 %v513_v51  ;;  %v546_v50 = vld [vmem:[%s1720_s28 + $0xac8] sm:$0xff]  ;;  %v561_v51 = vld [vmem:[%s1720_s28 + $0xb40] sm:$0xff] }
  0xc7   : > { %1110 = vmatpush.msra.mxu0 %v463_v52  ;;  %1129 = vmatpush.msra.mxu1 %v480_v53  ;;  %v578_v52 = vld [vmem:[%s1720_s28 + $0xbc8] sm:$0xff]  ;;  %v528_v53 = vld [vmem:[%s1720_s28 + $0xa38] sm:$0xff] }
  0xc8   : > { %1150 = vmatpush.msra.mxu2 %v495_v54  ;;  %1169 = vmatpush.msra.mxu3 %v512_v55  ;;  %v545_v54 = vld [vmem:[%s1720_s28 + $0xac0] sm:$0xff]  ;;  %v560_v55 = vld [vmem:[%s1720_s28 + $0xb38] sm:$0xff] }
  0xc9   : > { %1111 = vmatpush.msra.mxu0 %v462_v56  ;;  %1130 = vmatpush.msra.mxu1 %v479_v57  ;;  %v577_v56 = vld [vmem:[%s1720_s28 + $0xbc0] sm:$0xff]  ;;  %v527_v57 = vld [vmem:[%s1720_s28 + $0xa30] sm:$0xff] }
  0xca   : > { %1151 = vmatpush.msra.mxu2 %v494_v58  ;;  %1170 = vmatpush.msra.mxu3 %v511_v59  ;;  %v544_v58 = vld [vmem:[%s1720_s28 + $0xab8] sm:$0xff]  ;;  %v559_v59 = vld [vmem:[%s1720_s28 + $0xb30] sm:$0xff] }
  0xcb   : > { %1112 = vmatpush.msra.mxu0 %v461_v60  ;;  %1131 = vmatpush.msra.mxu1 %v478_v61  ;;  %v576_v60 = vld [vmem:[%s1720_s28 + $0xbb8] sm:$0xff]  ;;  %v526_v61 = vld [vmem:[%s1720_s28 + $0xa28] sm:$0xff] }
  0xcc   : > { %1152 = vmatpush.msra.mxu2 %v493_v62  ;;  %1171 = vmatpush.msra.mxu3 %v510_v63  ;;  %v543_v62 = vld [vmem:[%s1720_s28 + $0xab0] sm:$0xff]  ;;  %v558_v63 = vld [vmem:[%s1720_s28 + $0xb28] sm:$0xff] }
  0xcd   : > { %1113 = vmatpush.msra.mxu0 %v460_v0  ;;  %1132 = vmatpush.msra.mxu1 %v477_v2  ;;  %v575_v0 = vld [vmem:[%s1720_s28 + $0xbb0] sm:$0xff]  ;;  %v525_v2 = vld [vmem:[%s1720_s28 + $0xa20] sm:$0xff] }
  0xce   : > { %1153 = vmatpush.msra.mxu2 %v492_v3  ;;  %1172 = vmatpush.msra.mxu3 %v509_v4  ;;  %v542_v3 = vld [vmem:[%s1720_s28 + $0xaa8] sm:$0xff]  ;;  %v557_v4 = vld [vmem:[%s1720_s28 + $0xb20] sm:$0xff] }
  0xcf   : > { %1114 = vmatpush.msra.mxu0 %v459_v5  ;;  %1133 = vmatpush.msra.mxu1 %v476_v6  ;;  %v574_v5 = vld [vmem:[%s1720_s28 + $0xba8] sm:$0xff]  ;;  %v524_v6 = vld [vmem:[%s1720_s28 + $0xa18] sm:$0xff] }
  0xd0   : > { %1154 = vmatpush.msra.mxu2 %v491_v7  ;;  %1173 = vmatpush.msra.mxu3 %v508_v8  ;;  %v541_v7 = vld [vmem:[%s1720_s28 + $0xaa0] sm:$0xff]  ;;  %v556_v8 = vld [vmem:[%s1720_s28 + $0xb18] sm:$0xff] }
  0xd1   : > { %1115 = vmatpush.msra.mxu0 %v458_v9  ;;  %1134 = vmatpush.msra.mxu1 %v475_v10  ;;  %v573_v9 = vld [vmem:[%s1720_s28 + $0xba0] sm:$0xff]  ;;  %v523_v10 = vld [vmem:[%s1720_s28 + $0xa10] sm:$0xff] }
  0xd2   : > { %1155 = vmatpush.msra.mxu2 %v490_v12  ;;  %1174 = vmatpush.msra.mxu3 %v507_v13  ;;  %v540_v12 = vld [vmem:[%s1720_s28 + $0xa98] sm:$0xff]  ;;  %v555_v13 = vld [vmem:[%s1720_s28 + $0xb10] sm:$0xff] }
  0xd3   : > { %1116 = vmatpush.msra.mxu0 %v457_v14  ;;  %1135 = vmatpush.msra.mxu1 %v474_v15  ;;  %v572_v14 = vld [vmem:[%s1720_s28 + $0xb98] sm:$0xff]  ;;  %v522_v15 = vld [vmem:[%s1720_s28 + $0xa08] sm:$0xff] }
  0xd4   : > { %1156 = vmatpush.msra.mxu2 %v489_v16  ;;  %1175 = vmatpush.msra.mxu3 %v506_v17  ;;  %v539_v16 = vld [vmem:[%s1720_s28 + $0xa90] sm:$0xff]  ;;  %v554_v17 = vld [vmem:[%s1720_s28 + $0xb08] sm:$0xff] }
  0xd5   : > { %1117 = vmatmul.f32.vlgmr.msra.gmra.mxu0 %v733_v18  ;;  %1157 = vmatmul.f32.vlgmr.msra.gmra.mxu2 %v735_v19  ;;  %v571_v18 = vld [vmem:[%s1720_s28 + $0xb90] sm:$0xff]  ;;  %v521_v19 = vld [vmem:[%s1720_s28 + $0xa00] sm:$0xff] }
  0xd6   : > { %1181 = vmatpush.msrb.mxu0 %v536_v20  ;;  %1221 = vmatpush.msrb.mxu2 %v568_v21  ;;  %v538_v20 = vld [vmem:[%s1720_s28 + $0xa88] sm:$0xff]  ;;  %v553_v21 = vld [vmem:[%s1720_s28 + $0xb00] sm:$0xff] }
  0xd7   : > { %1136 = vmatpush.msra.mxu1 %v473_v22  ;;  %1176 = vmatpush.msra.mxu3 %v505_v23  ;;  %v570_v22 = vld [vmem:[%s1720_s28 + $0xb88] sm:$0xff]  ;;  %v737_v23 = vperm.slane %v2080_v11, 4 }
  0xd8   : > { %1137 = vmatmul.f32.vlgmr.msra.gmra.mxu1 %v734_v24  ;;  %1177 = vmatmul.f32.vlgmr.msra.gmra.mxu3 %v736_v25  ;;  %v739_v24 = vperm.slane %v2080_v11, 6  ;;  %v600_v25 = vld [vmem:[%s1720_s28 + $0xc78] sm:$0xff] }
  0xd9   : > { %1182 = vmatpush.msrb.mxu0 %v535_v1  ;;  %1201 = vmatpush.msrb.mxu1 %v552_v26  ;;  %v632_v1 = vld [vmem:[%s1720_s28 + $0xd78] sm:$0xff]  ;;  %v537_v26 = vld [vmem:[%s1720_s28 + $0xa80] sm:$0xff] }
  0xda   : > { %1222 = vmatpush.msrb.mxu2 %v567_v27  ;;  %1241 = vmatpush.msrb.mxu3 %v584_v28  ;;  %v569_v27 = vld [vmem:[%s1720_s28 + $0xb80] sm:$0xff]  ;;  %v738_v28 = vperm.slane %v2080_v11, 5 }
  0xdb   : > { %1183 = vmatpush.msrb.mxu0 %v534_v29  ;;  %1202 = vmatpush.msrb.mxu1 %v551_v30  ;;  %v740_v29 = vperm.slane %v2080_v11, 7  ;;  %v599_v30 = vld [vmem:[%s1720_s28 + $0xc70] sm:$0xff] }
  0xdc   : > { %1223 = vmatpush.msrb.mxu2 %v566_v31  ;;  %1242 = vmatpush.msrb.mxu3 %v583_v32  ;;  %v616_v31 = vld [vmem:[%s1720_s28 + $0xcf8] sm:$0xff]  ;;  %v631_v32 = vld [vmem:[%s1720_s28 + $0xd70] sm:$0xff] }
  0xdd   : > { %1184 = vmatpush.msrb.mxu0 %v533_v33  ;;  %1203 = vmatpush.msrb.mxu1 %v550_v34  ;;  %v648_v33 = vld [vmem:[%s1720_s28 + $0xdf8] sm:$0xff]  ;;  %v598_v34 = vld [vmem:[%s1720_s28 + $0xc68] sm:$0xff]  ;;  %v615_v11 = vld [vmem:[%s1720_s28 + $0xcf0] sm:$0xff] }
  0xde   : > { %1224 = vmatpush.msrb.mxu2 %v565_v35  ;;  %1243 = vmatpush.msrb.mxu3 %v582_v36  ;;  %v630_v35 = vld [vmem:[%s1720_s28 + $0xd68] sm:$0xff]  ;;  %v647_v36 = vld [vmem:[%s1720_s28 + $0xdf0] sm:$0xff] }
  0xdf   : > { %1185 = vmatpush.msrb.mxu0 %v532_v37  ;;  %1204 = vmatpush.msrb.mxu1 %v549_v38  ;;  %v597_v37 = vld [vmem:[%s1720_s28 + $0xc60] sm:$0xff]  ;;  %v614_v38 = vld [vmem:[%s1720_s28 + $0xce8] sm:$0xff] }
  0xe0   : > { %1225 = vmatpush.msrb.mxu2 %v564_v39  ;;  %1244 = vmatpush.msrb.mxu3 %v581_v40  ;;  %v629_v39 = vld [vmem:[%s1720_s28 + $0xd60] sm:$0xff]  ;;  %v646_v40 = vld [vmem:[%s1720_s28 + $0xde8] sm:$0xff] }
  0xe1   : > { %1186 = vmatpush.msrb.mxu0 %v531_v41  ;;  %1205 = vmatpush.msrb.mxu1 %v548_v42  ;;  %v596_v41 = vld [vmem:[%s1720_s28 + $0xc58] sm:$0xff]  ;;  %v613_v42 = vld [vmem:[%s1720_s28 + $0xce0] sm:$0xff] }
  0xe2   : > { %1226 = vmatpush.msrb.mxu2 %v563_v43  ;;  %1245 = vmatpush.msrb.mxu3 %v580_v44  ;;  %v628_v43 = vld [vmem:[%s1720_s28 + $0xd58] sm:$0xff]  ;;  %v645_v44 = vld [vmem:[%s1720_s28 + $0xde0] sm:$0xff] }
  0xe3   : > { %1187 = vmatpush.msrb.mxu0 %v530_v45  ;;  %1206 = vmatpush.msrb.mxu1 %v547_v46  ;;  %v595_v45 = vld [vmem:[%s1720_s28 + $0xc50] sm:$0xff]  ;;  %v612_v46 = vld [vmem:[%s1720_s28 + $0xcd8] sm:$0xff] }
  0xe4   : > { %1227 = vmatpush.msrb.mxu2 %v562_v47  ;;  %1246 = vmatpush.msrb.mxu3 %v579_v48  ;;  %v627_v47 = vld [vmem:[%s1720_s28 + $0xd50] sm:$0xff]  ;;  %v644_v48 = vld [vmem:[%s1720_s28 + $0xdd8] sm:$0xff] }
  0xe5   : > { %1188 = vmatpush.msrb.mxu0 %v529_v49  ;;  %1207 = vmatpush.msrb.mxu1 %v546_v50  ;;  %v594_v49 = vld [vmem:[%s1720_s28 + $0xc48] sm:$0xff]  ;;  %v611_v50 = vld [vmem:[%s1720_s28 + $0xcd0] sm:$0xff] }
  0xe6   : > { %1228 = vmatpush.msrb.mxu2 %v561_v51  ;;  %1247 = vmatpush.msrb.mxu3 %v578_v52  ;;  %v626_v51 = vld [vmem:[%s1720_s28 + $0xd48] sm:$0xff]  ;;  %v643_v52 = vld [vmem:[%s1720_s28 + $0xdd0] sm:$0xff] }
  0xe7   : > { %1189 = vmatpush.msrb.mxu0 %v528_v53  ;;  %1208 = vmatpush.msrb.mxu1 %v545_v54  ;;  %v593_v53 = vld [vmem:[%s1720_s28 + $0xc40] sm:$0xff]  ;;  %v610_v54 = vld [vmem:[%s1720_s28 + $0xcc8] sm:$0xff] }
  0xe8   : > { %1229 = vmatpush.msrb.mxu2 %v560_v55  ;;  %1248 = vmatpush.msrb.mxu3 %v577_v56  ;;  %v625_v55 = vld [vmem:[%s1720_s28 + $0xd40] sm:$0xff]  ;;  %v642_v56 = vld [vmem:[%s1720_s28 + $0xdc8] sm:$0xff] }
  0xe9   : > { %1190 = vmatpush.msrb.mxu0 %v527_v57  ;;  %1209 = vmatpush.msrb.mxu1 %v544_v58  ;;  %v592_v57 = vld [vmem:[%s1720_s28 + $0xc38] sm:$0xff]  ;;  %v609_v58 = vld [vmem:[%s1720_s28 + $0xcc0] sm:$0xff] }
  0xea   : > { %1230 = vmatpush.msrb.mxu2 %v559_v59  ;;  %1249 = vmatpush.msrb.mxu3 %v576_v60  ;;  %v624_v59 = vld [vmem:[%s1720_s28 + $0xd38] sm:$0xff]  ;;  %v641_v60 = vld [vmem:[%s1720_s28 + $0xdc0] sm:$0xff] }
  0xeb   : > { %1191 = vmatpush.msrb.mxu0 %v526_v61  ;;  %1210 = vmatpush.msrb.mxu1 %v543_v62  ;;  %v591_v61 = vld [vmem:[%s1720_s28 + $0xc30] sm:$0xff]  ;;  %v608_v62 = vld [vmem:[%s1720_s28 + $0xcb8] sm:$0xff] }
  0xec   : > { %1231 = vmatpush.msrb.mxu2 %v558_v63  ;;  %1250 = vmatpush.msrb.mxu3 %v575_v0  ;;  %v623_v63 = vld [vmem:[%s1720_s28 + $0xd30] sm:$0xff]  ;;  %v640_v0 = vld [vmem:[%s1720_s28 + $0xdb8] sm:$0xff] }
  0xed   : > { %1192 = vmatpush.msrb.mxu0 %v525_v2  ;;  %1211 = vmatpush.msrb.mxu1 %v542_v3  ;;  %v590_v2 = vld [vmem:[%s1720_s28 + $0xc28] sm:$0xff]  ;;  %v607_v3 = vld [vmem:[%s1720_s28 + $0xcb0] sm:$0xff] }
  0xee   : > { %1232 = vmatpush.msrb.mxu2 %v557_v4  ;;  %1251 = vmatpush.msrb.mxu3 %v574_v5  ;;  %v622_v4 = vld [vmem:[%s1720_s28 + $0xd28] sm:$0xff]  ;;  %v639_v5 = vld [vmem:[%s1720_s28 + $0xdb0] sm:$0xff] }
  0xef   : > { %1193 = vmatpush.msrb.mxu0 %v524_v6  ;;  %1212 = vmatpush.msrb.mxu1 %v541_v7  ;;  %v589_v6 = vld [vmem:[%s1720_s28 + $0xc20] sm:$0xff]  ;;  %v606_v7 = vld [vmem:[%s1720_s28 + $0xca8] sm:$0xff] }
  0xf0   : > { %1233 = vmatpush.msrb.mxu2 %v556_v8  ;;  %1252 = vmatpush.msrb.mxu3 %v573_v9  ;;  %v621_v8 = vld [vmem:[%s1720_s28 + $0xd20] sm:$0xff]  ;;  %v638_v9 = vld [vmem:[%s1720_s28 + $0xda8] sm:$0xff] }
  0xf1   : > { %1194 = vmatpush.msrb.mxu0 %v523_v10  ;;  %1213 = vmatpush.msrb.mxu1 %v540_v12  ;;  %v588_v10 = vld [vmem:[%s1720_s28 + $0xc18] sm:$0xff]  ;;  %v605_v12 = vld [vmem:[%s1720_s28 + $0xca0] sm:$0xff] }
  0xf2   : > { %1234 = vmatpush.msrb.mxu2 %v555_v13  ;;  %1253 = vmatpush.msrb.mxu3 %v572_v14  ;;  %v620_v13 = vld [vmem:[%s1720_s28 + $0xd18] sm:$0xff]  ;;  %v637_v14 = vld [vmem:[%s1720_s28 + $0xda0] sm:$0xff] }
  0xf3   : > { %1195 = vmatpush.msrb.mxu0 %v522_v15  ;;  %1214 = vmatpush.msrb.mxu1 %v539_v16  ;;  %v587_v15 = vld [vmem:[%s1720_s28 + $0xc10] sm:$0xff]  ;;  %v604_v16 = vld [vmem:[%s1720_s28 + $0xc98] sm:$0xff] }
  0xf4   : > { %1235 = vmatpush.msrb.mxu2 %v554_v17  ;;  %1254 = vmatpush.msrb.mxu3 %v571_v18  ;;  %v619_v17 = vld [vmem:[%s1720_s28 + $0xd10] sm:$0xff]  ;;  %v636_v18 = vld [vmem:[%s1720_s28 + $0xd98] sm:$0xff] }
  0xf5   : > { %1196 = vmatpush.msrb.mxu0 %v521_v19  ;;  %1215 = vmatpush.msrb.mxu1 %v538_v20  ;;  %v586_v19 = vld [vmem:[%s1720_s28 + $0xc08] sm:$0xff]  ;;  %v603_v20 = vld [vmem:[%s1720_s28 + $0xc90] sm:$0xff] }
  0xf6   : > { %1236 = vmatpush.msrb.mxu2 %v553_v21  ;;  %1255 = vmatpush.msrb.mxu3 %v570_v22  ;;  %v2219_v21 = vld [vmem:[%s1853_s5 + $0x18] sm:$0xff]  ;;  %v618_v22 = vld [vmem:[%s1720_s28 + $0xd08] sm:$0xff] }
  0xf7   : > { %1197 = vmatmul.f32.vlgmr.msrb.gmra.mxu0 %v737_v23  ;;  %1237 = vmatmul.f32.vlgmr.msrb.gmra.mxu2 %v739_v24  ;;  %v635_v23 = vld [vmem:[%s1720_s28 + $0xd90] sm:$0xff]  ;;  %v585_v24 = vld [vmem:[%s1720_s28 + $0xc00] sm:$0xff] }
  0xf8   : > { %1261 = vmatpush.msra.mxu0 %v600_v25  ;;  %1301 = vmatpush.msra.mxu2 %v632_v1  ;;  %v602_v25 = vld [vmem:[%s1720_s28 + $0xc88] sm:$0xff]  ;;  %v617_v1 = vld [vmem:[%s1720_s28 + $0xd00] sm:$0xff] }
  0xf9   : > { %1216 = vmatpush.msrb.mxu1 %v537_v26  ;;  %1256 = vmatpush.msrb.mxu3 %v569_v27  ;;  %v634_v26 = vld [vmem:[%s1720_s28 + $0xd88] sm:$0xff]  ;;  %v741_v27 = vperm.slane %v2219_v21, 0 }
  0xfa   : > { %1217 = vmatmul.f32.vlgmr.msrb.gmra.mxu1 %v738_v28  ;;  %1257 = vmatmul.f32.vlgmr.msrb.gmra.mxu3 %v740_v29  ;;  %v743_v28 = vperm.slane %v2219_v21, 2  ;;  %v664_v29 = vld [vmem:[%s1720_s28 + $0xe78] sm:$0xff] }
  0xfb   : > { %1262 = vmatpush.msra.mxu0 %v599_v30  ;;  %1281 = vmatpush.msra.mxu1 %v616_v31  ;;  %v696_v30 = vld [vmem:[%s1720_s28 + $0xf78] sm:$0xff]  ;;  %v601_v31 = vld [vmem:[%s1720_s28 + $0xc80] sm:$0xff] }
  0xfc   : > { %1302 = vmatpush.msra.mxu2 %v631_v32  ;;  %1321 = vmatpush.msra.mxu3 %v648_v33  ;;  %v633_v32 = vld [vmem:[%s1720_s28 + $0xd80] sm:$0xff]  ;;  %v742_v33 = vperm.slane %v2219_v21, 1 }
  0xfd   : > { %1263 = vmatpush.msra.mxu0 %v598_v34  ;;  %1282 = vmatpush.msra.mxu1 %v615_v11  ;;  %v744_v34 = vperm.slane %v2219_v21, 3  ;;  %v663_v11 = vld [vmem:[%s1720_s28 + $0xe70] sm:$0xff] }
  0xfe   : > { %1303 = vmatpush.msra.mxu2 %v630_v35  ;;  %1322 = vmatpush.msra.mxu3 %v647_v36  ;;  %v680_v35 = vld [vmem:[%s1720_s28 + $0xef8] sm:$0xff]  ;;  %v695_v36 = vld [vmem:[%s1720_s28 + $0xf70] sm:$0xff] }
  0xff   : > { %1264 = vmatpush.msra.mxu0 %v597_v37  ;;  %1283 = vmatpush.msra.mxu1 %v614_v38  ;;  %v712_v37 = vld [vmem:[%s1720_s28 + $0xff8] sm:$0xff]  ;;  %v662_v38 = vld [vmem:[%s1720_s28 + $0xe68] sm:$0xff] }
 0x100   : > { %1304 = vmatpush.msra.mxu2 %v629_v39  ;;  %1323 = vmatpush.msra.mxu3 %v646_v40  ;;  %v679_v39 = vld [vmem:[%s1720_s28 + $0xef0] sm:$0xff]  ;;  %v694_v40 = vld [vmem:[%s1720_s28 + $0xf68] sm:$0xff] }
 0x101   : > { %1265 = vmatpush.msra.mxu0 %v596_v41  ;;  %1284 = vmatpush.msra.mxu1 %v613_v42  ;;  %v711_v41 = vld [vmem:[%s1720_s28 + $0xff0] sm:$0xff]  ;;  %v661_v42 = vld [vmem:[%s1720_s28 + $0xe60] sm:$0xff] }
 0x102   : > { %1305 = vmatpush.msra.mxu2 %v628_v43  ;;  %1324 = vmatpush.msra.mxu3 %v645_v44  ;;  %v678_v43 = vld [vmem:[%s1720_s28 + $0xee8] sm:$0xff]  ;;  %v693_v44 = vld [vmem:[%s1720_s28 + $0xf60] sm:$0xff] }
 0x103   : > { %1266 = vmatpush.msra.mxu0 %v595_v45  ;;  %1285 = vmatpush.msra.mxu1 %v612_v46  ;;  %v710_v45 = vld [vmem:[%s1720_s28 + $0xfe8] sm:$0xff]  ;;  %v660_v46 = vld [vmem:[%s1720_s28 + $0xe58] sm:$0xff] }
 0x104   : > { %1306 = vmatpush.msra.mxu2 %v627_v47  ;;  %1325 = vmatpush.msra.mxu3 %v644_v48  ;;  %v677_v47 = vld [vmem:[%s1720_s28 + $0xee0] sm:$0xff]  ;;  %v692_v48 = vld [vmem:[%s1720_s28 + $0xf58] sm:$0xff] }
 0x105   : > { %1267 = vmatpush.msra.mxu0 %v594_v49  ;;  %1286 = vmatpush.msra.mxu1 %v611_v50  ;;  %v709_v49 = vld [vmem:[%s1720_s28 + $0xfe0] sm:$0xff]  ;;  %v659_v50 = vld [vmem:[%s1720_s28 + $0xe50] sm:$0xff] }
 0x106   : > { %1307 = vmatpush.msra.mxu2 %v626_v51  ;;  %1326 = vmatpush.msra.mxu3 %v643_v52  ;;  %v676_v51 = vld [vmem:[%s1720_s28 + $0xed8] sm:$0xff]  ;;  %v691_v52 = vld [vmem:[%s1720_s28 + $0xf50] sm:$0xff] }
 0x107   : > { %1268 = vmatpush.msra.mxu0 %v593_v53  ;;  %1287 = vmatpush.msra.mxu1 %v610_v54  ;;  %v708_v53 = vld [vmem:[%s1720_s28 + $0xfd8] sm:$0xff]  ;;  %v658_v54 = vld [vmem:[%s1720_s28 + $0xe48] sm:$0xff] }
 0x108   : > { %1308 = vmatpush.msra.mxu2 %v625_v55  ;;  %1327 = vmatpush.msra.mxu3 %v642_v56  ;;  %v675_v55 = vld [vmem:[%s1720_s28 + $0xed0] sm:$0xff]  ;;  %v690_v56 = vld [vmem:[%s1720_s28 + $0xf48] sm:$0xff] }
 0x109   : > { %1269 = vmatpush.msra.mxu0 %v592_v57  ;;  %1288 = vmatpush.msra.mxu1 %v609_v58  ;;  %v707_v57 = vld [vmem:[%s1720_s28 + $0xfd0] sm:$0xff]  ;;  %v657_v58 = vld [vmem:[%s1720_s28 + $0xe40] sm:$0xff] }
 0x10a   : > { %1309 = vmatpush.msra.mxu2 %v624_v59  ;;  %1328 = vmatpush.msra.mxu3 %v641_v60  ;;  %v674_v59 = vld [vmem:[%s1720_s28 + $0xec8] sm:$0xff]  ;;  %v689_v60 = vld [vmem:[%s1720_s28 + $0xf40] sm:$0xff] }
 0x10b   : > { %1270 = vmatpush.msra.mxu0 %v591_v61  ;;  %1289 = vmatpush.msra.mxu1 %v608_v62  ;;  %v706_v61 = vld [vmem:[%s1720_s28 + $0xfc8] sm:$0xff]  ;;  %v656_v62 = vld [vmem:[%s1720_s28 + $0xe38] sm:$0xff] }
 0x10c   : > { %1310 = vmatpush.msra.mxu2 %v623_v63  ;;  %1329 = vmatpush.msra.mxu3 %v640_v0  ;;  %v673_v63 = vld [vmem:[%s1720_s28 + $0xec0] sm:$0xff]  ;;  %v688_v0 = vld [vmem:[%s1720_s28 + $0xf38] sm:$0xff] }
 0x10d   : > { %1271 = vmatpush.msra.mxu0 %v590_v2  ;;  %1290 = vmatpush.msra.mxu1 %v607_v3  ;;  %v705_v2 = vld [vmem:[%s1720_s28 + $0xfc0] sm:$0xff]  ;;  %v655_v3 = vld [vmem:[%s1720_s28 + $0xe30] sm:$0xff] }
 0x10e   : > { %1311 = vmatpush.msra.mxu2 %v622_v4  ;;  %1330 = vmatpush.msra.mxu3 %v639_v5  ;;  %v672_v4 = vld [vmem:[%s1720_s28 + $0xeb8] sm:$0xff]  ;;  %v687_v5 = vld [vmem:[%s1720_s28 + $0xf30] sm:$0xff] }
 0x10f   : > { %1272 = vmatpush.msra.mxu0 %v589_v6  ;;  %1291 = vmatpush.msra.mxu1 %v606_v7  ;;  %v704_v6 = vld [vmem:[%s1720_s28 + $0xfb8] sm:$0xff]  ;;  %v654_v7 = vld [vmem:[%s1720_s28 + $0xe28] sm:$0xff] }
 0x110   : > { %1312 = vmatpush.msra.mxu2 %v621_v8  ;;  %1331 = vmatpush.msra.mxu3 %v638_v9  ;;  %v671_v8 = vld [vmem:[%s1720_s28 + $0xeb0] sm:$0xff]  ;;  %v686_v9 = vld [vmem:[%s1720_s28 + $0xf28] sm:$0xff] }
 0x111   : > { %1273 = vmatpush.msra.mxu0 %v588_v10  ;;  %1292 = vmatpush.msra.mxu1 %v605_v12  ;;  %v703_v10 = vld [vmem:[%s1720_s28 + $0xfb0] sm:$0xff]  ;;  %v653_v12 = vld [vmem:[%s1720_s28 + $0xe20] sm:$0xff] }
 0x112   : > { %1313 = vmatpush.msra.mxu2 %v620_v13  ;;  %1332 = vmatpush.msra.mxu3 %v637_v14  ;;  %v670_v13 = vld [vmem:[%s1720_s28 + $0xea8] sm:$0xff]  ;;  %v685_v14 = vld [vmem:[%s1720_s28 + $0xf20] sm:$0xff] }
 0x113   : > { %1274 = vmatpush.msra.mxu0 %v587_v15  ;;  %1293 = vmatpush.msra.mxu1 %v604_v16  ;;  %v702_v15 = vld [vmem:[%s1720_s28 + $0xfa8] sm:$0xff]  ;;  %v652_v16 = vld [vmem:[%s1720_s28 + $0xe18] sm:$0xff] }
 0x114   : > { %1314 = vmatpush.msra.mxu2 %v619_v17  ;;  %1333 = vmatpush.msra.mxu3 %v636_v18  ;;  %v669_v17 = vld [vmem:[%s1720_s28 + $0xea0] sm:$0xff]  ;;  %v684_v18 = vld [vmem:[%s1720_s28 + $0xf18] sm:$0xff] }
 0x115   : > { %1275 = vmatpush.msra.mxu0 %v586_v19  ;;  %1294 = vmatpush.msra.mxu1 %v603_v20  ;;  %v701_v19 = vld [vmem:[%s1720_s28 + $0xfa0] sm:$0xff]  ;;  %v651_v20 = vld [vmem:[%s1720_s28 + $0xe10] sm:$0xff] }
 0x116   : > { %1315 = vmatpush.msra.mxu2 %v618_v22  ;;  %1334 = vmatpush.msra.mxu3 %v635_v23  ;;  %v668_v22 = vld [vmem:[%s1720_s28 + $0xe98] sm:$0xff]  ;;  %v683_v23 = vld [vmem:[%s1720_s28 + $0xf10] sm:$0xff] }
 0x117   : > { %1276 = vmatpush.msra.mxu0 %v585_v24  ;;  %1295 = vmatpush.msra.mxu1 %v602_v25  ;;  %v700_v24 = vld [vmem:[%s1720_s28 + $0xf98] sm:$0xff]  ;;  %v650_v25 = vld [vmem:[%s1720_s28 + $0xe08] sm:$0xff] }
 0x118   : > { %1316 = vmatpush.msra.mxu2 %v617_v1  ;;  %1335 = vmatpush.msra.mxu3 %v634_v26  ;;  %v667_v1 = vld [vmem:[%s1720_s28 + $0xe90] sm:$0xff]  ;;  %v682_v26 = vld [vmem:[%s1720_s28 + $0xf08] sm:$0xff] }
 0x119   : > { %1277 = vmatmul.f32.vlgmr.msra.gmra.mxu0 %v741_v27  ;;  %1317 = vmatmul.f32.vlgmr.msra.gmra.mxu2 %v743_v28  ;;  %v699_v27 = vld [vmem:[%s1720_s28 + $0xf90] sm:$0xff]  ;;  %v649_v28 = vld [vmem:[%s1720_s28 + $0xe00] sm:$0xff] }
 0x11a   : > { %1341 = vmatpush.msrb.mxu0 %v664_v29  ;;  %1381 = vmatpush.msrb.mxu2 %v696_v30  ;;  %v666_v29 = vld [vmem:[%s1720_s28 + $0xe88] sm:$0xff]  ;;  %v681_v30 = vld [vmem:[%s1720_s28 + $0xf00] sm:$0xff] }
 0x11b   : > { %1296 = vmatpush.msra.mxu1 %v601_v31  ;;  %1336 = vmatpush.msra.mxu3 %v633_v32  ;;  %v698_v31 = vld [vmem:[%s1720_s28 + $0xf88] sm:$0xff]  ;;  %v745_v32 = vperm.slane %v2219_v21, 4 }
 0x11c   : > { %1297 = vmatmul.f32.vlgmr.msra.gmra.mxu1 %v742_v33  ;;  %1337 = vmatmul.f32.vlgmr.msra.gmra.mxu3 %v744_v34  ;;  %v747_v33 = vperm.slane %v2219_v21, 6  ;;  %v665_v34 = vld [vmem:[%s1720_s28 + $0xe80] sm:$0xff] }
 0x11d   : > { %1342 = vmatpush.msrb.mxu0 %v663_v11  ;;  %1361 = vmatpush.msrb.mxu1 %v680_v35  ;;  %v697_v11 = vld [vmem:[%s1720_s28 + $0xf80] sm:$0xff]  ;;  %v746_v35 = vperm.slane %v2219_v21, 5 }
 0x11e   : > { %1382 = vmatpush.msrb.mxu2 %v695_v36  ;;  %1401 = vmatpush.msrb.mxu3 %v712_v37  ;;  %v748_v36 = vperm.slane %v2219_v21, 7  ;;  %v818_v37 = vpop.f32.mrf.mxu1 }
 0x11f   : > { %1343 = vmatpush.msrb.mxu0 %v662_v38  ;;  %1362 = vmatpush.msrb.mxu1 %v679_v39  ;;  %v798_v38 = vpop.f32.mrf.mxu0 }
 0x120   : > { %1383 = vmatpush.msrb.mxu2 %v694_v40  ;;  %1402 = vmatpush.msrb.mxu3 %v711_v41  ;;  %v819_v39 = vadd.f32 %v818_v37, %v798_v38  ;;  %v838_v40 = vpop.f32.mrf.mxu2 }
 0x121   : > { %1344 = vmatpush.msrb.mxu0 %v661_v42  ;;  %1363 = vmatpush.msrb.mxu1 %v678_v43  ;;  %v858_v42 = vpop.f32.mrf.mxu3 }
 0x122   : > { %1384 = vmatpush.msrb.mxu2 %v693_v44  ;;  %1403 = vmatpush.msrb.mxu3 %v710_v45  ;;  %v839_v41 = vadd.f32 %v838_v40, %v819_v39 }
 0x123   : > { %1345 = vmatpush.msrb.mxu0 %v660_v46  ;;  %1364 = vmatpush.msrb.mxu1 %v677_v47 }
 0x124   : > { %1385 = vmatpush.msrb.mxu2 %v692_v48  ;;  %1404 = vmatpush.msrb.mxu3 %v709_v49  ;;  %v859_v43 = vadd.f32 %v858_v42, %v839_v41 }
 0x125   : > { %1346 = vmatpush.msrb.mxu0 %v659_v50  ;;  %1365 = vmatpush.msrb.mxu1 %v676_v51 }
 0x126   : > { %1386 = vmatpush.msrb.mxu2 %v691_v52  ;;  %1405 = vmatpush.msrb.mxu3 %v708_v53  ;;  %v898_v46 = vpop.f32.mrf.mxu1 }
 0x127   : > { %1347 = vmatpush.msrb.mxu0 %v658_v54  ;;  %1366 = vmatpush.msrb.mxu1 %v675_v55  ;;  %v878_v44 = vpop.f32.mrf.mxu0 }
 0x128   : > { %1387 = vmatpush.msrb.mxu2 %v690_v56  ;;  %1406 = vmatpush.msrb.mxu3 %v707_v57  ;;  %v879_v45 = vadd.f32 %v878_v44, %v859_v43  ;;  %v918_v21 = vpop.f32.mrf.mxu2 }
 0x129   : > { %1348 = vmatpush.msrb.mxu0 %v657_v58  ;;  %1367 = vmatpush.msrb.mxu1 %v674_v59  ;;  %v938_v49 = vpop.f32.mrf.mxu3 }
 0x12a   : > { %1388 = vmatpush.msrb.mxu2 %v689_v60  ;;  %1407 = vmatpush.msrb.mxu3 %v706_v61  ;;  %v899_v47 = vadd.f32 %v898_v46, %v879_v45 }
 0x12b   : > { %1349 = vmatpush.msrb.mxu0 %v656_v62  ;;  %1368 = vmatpush.msrb.mxu1 %v673_v63 }
 0x12c   : > { %1389 = vmatpush.msrb.mxu2 %v688_v0  ;;  %1408 = vmatpush.msrb.mxu3 %v705_v2  ;;  %v919_v48 = vadd.f32 %v918_v21, %v899_v47 }
 0x12d   : > { %1350 = vmatpush.msrb.mxu0 %v655_v3  ;;  %1369 = vmatpush.msrb.mxu1 %v672_v4 }
 0x12e   : > { %1390 = vmatpush.msrb.mxu2 %v687_v5  ;;  %1409 = vmatpush.msrb.mxu3 %v704_v6  ;;  %v939_v51 = vadd.f32 %v938_v49, %v919_v48  ;;  %v978_v53 = vpop.f32.mrf.mxu1 }
 0x12f   : > { %1351 = vmatpush.msrb.mxu0 %v654_v7  ;;  %1370 = vmatpush.msrb.mxu1 %v671_v8  ;;  %v958_v50 = vpop.f32.mrf.mxu0 }
 0x130   : > { %1391 = vmatpush.msrb.mxu2 %v686_v9  ;;  %1410 = vmatpush.msrb.mxu3 %v703_v10  ;;  %v959_v52 = vadd.f32 %v958_v50, %v939_v51  ;;  %v998_v54 = vpop.f32.mrf.mxu2 }
 0x131   : > { %1352 = vmatpush.msrb.mxu0 %v653_v12  ;;  %1371 = vmatpush.msrb.mxu1 %v670_v13  ;;  %v1018_v57 = vpop.f32.mrf.mxu3 }
 0x132   : > { %1392 = vmatpush.msrb.mxu2 %v685_v14  ;;  %1411 = vmatpush.msrb.mxu3 %v702_v15  ;;  %v979_v55 = vadd.f32 %v978_v53, %v959_v52 }
 0x133   : > { %1353 = vmatpush.msrb.mxu0 %v652_v16  ;;  %1372 = vmatpush.msrb.mxu1 %v669_v17 }
 0x134   : > { %1393 = vmatpush.msrb.mxu2 %v684_v18  ;;  %1412 = vmatpush.msrb.mxu3 %v701_v19  ;;  %v999_v56 = vadd.f32 %v998_v54, %v979_v55 }
 0x135   : > { %1354 = vmatpush.msrb.mxu0 %v651_v20  ;;  %1373 = vmatpush.msrb.mxu1 %v668_v22 }
 0x136   : > { %1394 = vmatpush.msrb.mxu2 %v683_v23  ;;  %1413 = vmatpush.msrb.mxu3 %v700_v24  ;;  %v1019_v59 = vadd.f32 %v1018_v57, %v999_v56  ;;  %v1058_v61 = vpop.f32.mrf.mxu1 }
 0x137   : > { %1355 = vmatpush.msrb.mxu0 %v650_v25  ;;  %1374 = vmatpush.msrb.mxu1 %v667_v1  ;;  %v1038_v58 = vpop.f32.mrf.mxu0 }
 0x138   : > { %1395 = vmatpush.msrb.mxu2 %v682_v26  ;;  %1414 = vmatpush.msrb.mxu3 %v699_v27  ;;  %v1039_v60 = vadd.f32 %v1038_v58, %v1019_v59  ;;  %v1078_v62 = vpop.f32.mrf.mxu2 }
 0x139   : > { %1356 = vmatpush.msrb.mxu0 %v649_v28  ;;  %1375 = vmatpush.msrb.mxu1 %v666_v29  ;;  %v1098_v2 = vpop.f32.mrf.mxu3 }
 0x13a   : > { %1396 = vmatpush.msrb.mxu2 %v681_v30  ;;  %1415 = vmatpush.msrb.mxu3 %v698_v31  ;;  %v1059_v63 = vadd.f32 %v1058_v61, %v1039_v60 }
 0x13b   : > { %1357 = vmatmul.f32.vlgmr.msrb.gmra.mxu0 %v745_v32  ;;  %1397 = vmatmul.f32.vlgmr.msrb.gmra.mxu2 %v747_v33 }
 0x13c   : > { %1376 = vmatpush.msrb.mxu1 %v665_v34  ;;  %1416 = vmatpush.msrb.mxu3 %v697_v11  ;;  %v1079_v0 = vadd.f32 %v1078_v62, %v1059_v63 }
 0x13d   : > { %1377 = vmatmul.f32.vlgmr.msrb.gmra.mxu1 %v746_v35  ;;  %1417 = vmatmul.f32.vlgmr.msrb.gmra.mxu3 %v748_v36 }
 0x13e   : > { %v1099_v4 = vadd.f32 %v1098_v2, %v1079_v0 }
 0x152   : > { %v1118_v3 = vpop.f32.mrf.mxu0 }
 0x153   : > { %v1119_v5 = vadd.f32 %v1118_v3, %v1099_v4 }
 0x155   : > { %v1138_v6 = vpop.f32.mrf.mxu1 }
 0x156   : > { %v1139_v8 = vadd.f32 %v1138_v6, %v1119_v5 }
 0x158   : > { %v1158_v7 = vpop.f32.mrf.mxu2 }
 0x159   : > { %v1159_v9 = vadd.f32 %v1158_v7, %v1139_v8 }
 0x15b   : > { %v1178_v10 = vpop.f32.mrf.mxu3 }
 0x15c   : > { %v1179_v13 = vadd.f32 %v1178_v10, %v1159_v9 }
 0x174   : > { %v1198_v12 = vpop.f32.mrf.mxu0 }
 0x175   : > { %v1199_v14 = vadd.f32 %v1198_v12, %v1179_v13 }
 0x177   : > { %v1218_v15 = vpop.f32.mrf.mxu1 }
 0x178   : > { %v1219_v17 = vadd.f32 %v1218_v15, %v1199_v14 }
 0x17a   : > { %v1238_v16 = vpop.f32.mrf.mxu2 }
 0x17b   : > { %v1239_v18 = vadd.f32 %v1238_v16, %v1219_v17 }
 0x17d   : > { %v1258_v19 = vpop.f32.mrf.mxu3 }
 0x17e   : > { %v1259_v22 = vadd.f32 %v1258_v19, %v1239_v18 }
 0x196   : > { %v1278_v20 = vpop.f32.mrf.mxu0 }
 0x197   : > { %v1279_v23 = vadd.f32 %v1278_v20, %v1259_v22 }
 0x199   : > { %v1298_v24 = vpop.f32.mrf.mxu1 }
 0x19a   : > { %v1299_v1 = vadd.f32 %v1298_v24, %v1279_v23 }
 0x19c   : > { %v1318_v25 = vpop.f32.mrf.mxu2 }
 0x19d   : > { %v1319_v26 = vadd.f32 %v1318_v25, %v1299_v1 }
 0x19f   : > { %v1338_v27 = vpop.f32.mrf.mxu3 }
 0x1a0   : > { %v1339_v28 = vadd.f32 %v1338_v27, %v1319_v26 }
 0x1b8   : > { %v1358_v29 = vpop.f32.mrf.mxu0 }
 0x1b9   : > { %v1359_v30 = vadd.f32 %v1358_v29, %v1339_v28 }
 0x1ba   : > { %v1378_v31 = vpop.f32.mrf.mxu1 }
 0x1bb   : > { %v1379_v32 = vadd.f32 %v1378_v31, %v1359_v30 }
 0x1be   : > { %v1398_v33 = vpop.f32.mrf.mxu2 }
 0x1bf   : > { %v1399_v34 = vadd.f32 %v1398_v33, %v1379_v32 }
 0x1c0   : > { %v1418_v11 = vpop.f32.mrf.mxu3 }
 0x1c1   : > { %v1419_v35 = vadd.f32 %v1418_v11, %v1399_v34 }
 0x1c3   : > { %1421 = vst [vmem:[%s196_s8] sm:$0x1] %v1419_v35 }
 0x1c4 PF: > { %p21_p8 = scmp.ge.s32.totalorder %s1672_s20, 4   ;;  %s2327_s16 = smov %s1614_s17 }
 0x1c5   : > { %s2328_s17 = smov %s1618_s18  ;;  %s2329_s18 = smov %s1682_s23 }
 0x1c6   : > { %s2330_s19 = smov %s1672_s20  ;;  %23 = sbr.rel (!%p21_p8) target bundleno = 9 (0x9), region = 71 }
 0x1cb   :  { %1439 = vsyncpa [#allocation5], 1 }
 0x1cc   :  { %1441 = vsyncpa [#allocation5 + $0x1], 1 }

</bundles_post_ra>
